<compile_context>
chip_gen: v7x
topology: tpu7x:2x2x1
jax: 0.10.0
libtpu: 0.0.40
codegen_flags: <defaults>
</compile_context>

<pallas_src>
import functools

import jax
import jax.numpy as jnp
from jax import lax
from jax.experimental import pallas as pl
from jax.experimental.pallas import tpu as pltpu


def _round_up(x, m):
    return ((x + m - 1) // m) * m


# --------------------------------------------------------------------------
# Kernel A: tiled candidate-pair mask  (coor_dist_sq < thresh  ->  int8)
# --------------------------------------------------------------------------
def _cand_mask_kernel(a_ref, bt_ref, o_ref, *, thresh_sq):
    # a_ref:  [TM, 3]  source coords tile (rows)
    # bt_ref: [3, TN]  target coords tile, transposed -> lane-dense columns
    # o_ref:  [TM, TN] int8 mask tile (1 where squared distance < thresh_sq)
    a = a_ref[...]
    bt = bt_ref[...]
    dx = a[:, 0:1] - bt[0:1, :]          # VPU broadcast-subtract per coordinate
    dy = a[:, 1:2] - bt[1:2, :]
    dz = a[:, 2:3] - bt[2:3, :]
    d2 = dx * dx + dy * dy + dz * dz     # no K=3 MXU matmul, no cancellation
    o_ref[...] = (d2 < thresh_sq).astype(o_ref.dtype)


def candidate_pair_mask(coor_s, coor_t, thresh_sq):
    """int8 mask [N, M] of candidate correspondences (squared dist < thresh)."""
    n = coor_s.shape[0]
    m = coor_t.shape[0]
    # Tile sizes: up to 1024x1024 (fits all VMEM budgets, pipelines, and keeps
    # the padded 3036-point case at 3072 = 3 tiles per axis). Shrink-to-fit
    # (aligned) for small inputs so the grid stays a single step.
    tm = min(1024, _round_up(n, 32))     # 32-row alignment: int8 sublane packing
    tn = min(1024, _round_up(m, 128))
    np_ = _round_up(n, tm)
    mp_ = _round_up(m, tn)
    a = jnp.pad(coor_s.astype(jnp.float32), ((0, np_ - n), (0, 0)))
    # [M,3] -> [3,M] transpose is a tiny (<40 KB) host-side op; it buys us a
    # lane-dense (3, TN) tile so the in-kernel math is pure VPU broadcasts.
    bt = jnp.pad(coor_t.astype(jnp.float32), ((0, mp_ - m), (0, 0))).T

    mask = pl.pallas_call(
        functools.partial(_cand_mask_kernel, thresh_sq=float(thresh_sq)),
        out_shape=jax.ShapeDtypeStruct((np_, mp_), jnp.int8),
        grid=(np_ // tm, mp_ // tn),
        in_specs=[pl.BlockSpec((tm, 3), lambda i, j: (i, 0)),
                  pl.BlockSpec((3, tn), lambda i, j: (0, j))],
        out_specs=pl.BlockSpec((tm, tn), lambda i, j: (i, j)),
        compiler_params=pltpu.CompilerParams(
            dimension_semantics=("parallel", "parallel"),
            # budget note: ~3.2 MiB double-buffered at 1024x1024 tiles; 16 MiB
            # is safe on every generation (v5e/v6e/v7x).
            vmem_limit_bytes=16 * 1024 * 1024),
    )(a, bt)
    return mask[:n, :m]


# --------------------------------------------------------------------------
# Kernel B: fused pairwise distances + circle loss + feature-match recall
# --------------------------------------------------------------------------
def _circle_loss_fused_kernel(cs_ref, ctT_ref, fs_ref, ft_ref, vrow_ref, vcol_ref,
                              recall_ref, loss_ref, *,
                              pos_radius, safe_radius, pos_optimal, neg_optimal,
                              pos_margin, neg_margin, log_scale):
    f32 = jnp.float32
    cs = cs_ref[...]        # [P, 3]  selected source coords (zero-padded rows)
    ctT = ctT_ref[...]      # [3, P]  selected target coords, transposed
    fs = fs_ref[...]        # [P, C]  selected source feats
    ft = ft_ref[...]        # [P, C]  selected target feats
    vrow = vrow_ref[...]    # [P, 1]  1.0 for valid correspondence rows
    vcol = vcol_ref[...]    # [1, P]  1.0 for valid correspondence cols
    p = cs.shape[0]

    valid = (vrow * vcol) > 0.0                    # [P, P] valid-pair mask
    valid_f = valid.astype(f32)

    # coords_dist: direct squared-diff (VPU, no cancellation), clamp + sqrt
    # matches torch.sqrt(square_distance(...).clamp(min=1e-12))
    dx = cs[:, 0:1] - ctT[0:1, :]
    dy = cs[:, 1:2] - ctT[1:2, :]
    dz = cs[:, 2:3] - ctT[2:3, :]
    cd = jnp.sqrt(jnp.maximum(dx * dx + dy * dy + dz * dz, 1e-12))

    # feats_dist (normalised): -2<fs,ft> + 2, clamp, sqrt (MXU, no host transpose)
    fdot = lax.dot_general(fs, ft, (((1,), (1,)), ((), ())),
                           preferred_element_type=jnp.float32)
    fd = jnp.sqrt(jnp.maximum(2.0 - 2.0 * fdot, 1e-12))

    pos_f = jnp.where(cd < pos_radius, valid_f, 0.0)
    neg_f = jnp.where(cd > safe_radius, valid_f, 0.0)

    # row/col reductions of pos/neg masks, computed once and reused
    pos_row = jnp.sum(pos_f, axis=-1, keepdims=True)     # [P,1]
    neg_row = jnp.sum(neg_f, axis=-1, keepdims=True)     # [P,1]
    pos_col = jnp.sum(pos_f, axis=0, keepdims=True)      # [1,P]
    neg_col = jnp.sum(neg_f, axis=0, keepdims=True)      # [1,P]
    row_has_pos = (pos_row > 0.0).astype(f32)            # [P,1]

    # ------------------------- recall -------------------------
    big = jnp.float32(1e30)
    col_iota = lax.broadcasted_iota(f32, (p, p), 1)
    fd_v = jnp.where(valid, fd, big)                      # argmin only over valid cols
    row_min = jnp.min(fd_v, axis=-1, keepdims=True)
    # first column index attaining the row minimum (torch.min semantics)
    sel_idx = jnp.min(jnp.where(fd_v == row_min, col_iota, jnp.float32(p)),
                      axis=-1, keepdims=True)
    sel_dist = jnp.sum(jnp.where(col_iota == sel_idx, cd, 0.0),
                       axis=-1, keepdims=True)
    n_gt_pos = jnp.sum(row_has_pos, axis=(0, 1), keepdims=True) + 1e-12
    n_pred_pos = jnp.sum(jnp.where(sel_dist < pos_radius, row_has_pos, 0.0),
                         axis=(0, 1), keepdims=True)
    recall_ref[...] = n_pred_pos / n_gt_pos

    # ----------------------- circle loss -----------------------
    row_sel = jnp.where(neg_row > 0.0, row_has_pos, 0.0)                       # [P,1]
    col_sel = jnp.logical_and(pos_col > 0.0, neg_col > 0.0).astype(f32)        # [1,P]

    pos_w = jnp.maximum(fd - 100000.0 * (1.0 - pos_f) - pos_optimal, 0.0)
    neg_w = jnp.maximum(neg_optimal - (fd + 100000.0 * (1.0 - neg_f)), 0.0)
    x_pos = log_scale * (fd - pos_margin) * pos_w
    x_neg = log_scale * (neg_margin - fd) * neg_w
    # exclude padded rows/cols from the logsumexp sums
    neg_big = jnp.float32(-1e30)
    xp = jnp.where(valid, x_pos, neg_big)
    xn = jnp.where(valid, x_neg, neg_big)

    def lse(x, axis):
        m = jnp.max(x, axis=axis, keepdims=True)
        return m + jnp.log(jnp.sum(jnp.exp(x - m), axis=axis, keepdims=True))

    def softplus(x):
        return jnp.maximum(x, 0.0) + jnp.log(1.0 + jnp.exp(-jnp.abs(x)))

    loss_row = softplus(lse(xp, -1) + lse(xn, -1)) / log_scale     # [P,1]
    loss_col = softplus(lse(xp, 0) + lse(xn, 0)) / log_scale       # [1,P]

    # +1e-12 guards the empty-selection edge case (original torch code NaNs)
    mean_row = (jnp.sum(loss_row * row_sel, axis=(0, 1), keepdims=True)
                / (jnp.sum(row_sel, axis=(0, 1), keepdims=True) + 1e-12))
    mean_col = (jnp.sum(loss_col * col_sel, axis=(0, 1), keepdims=True)
                / (jnp.sum(col_sel, axis=(0, 1), keepdims=True) + 1e-12))
    loss_ref[...] = (mean_row + mean_col) * 0.5


def circle_loss_and_recall(coor_s_sel, coor_t_sel, feats_s_sel, feats_t_sel,
                           p_block, cfg):
    """Single fused Pallas call on the selected correspondences."""
    f32 = jnp.float32
    n = coor_s_sel.shape[0]            # valid correspondences (<= p_block)
    c = feats_s_sel.shape[1]
    pad_r = p_block - n
    cs = jnp.pad(coor_s_sel.astype(f32), ((0, pad_r), (0, 0)))
    ctT = jnp.pad(coor_t_sel.astype(f32), ((0, pad_r), (0, 0))).T   # [3,P] tiny
    fs = jnp.pad(feats_s_sel.astype(f32), ((0, pad_r), (0, 0)))
    ft = jnp.pad(feats_t_sel.astype(f32), ((0, pad_r), (0, 0)))
    vrow = jnp.pad(jnp.ones((n, 1), f32), ((0, pad_r), (0, 0)))     # [P,1]
    vcol = vrow.T                                                   # [1,P]

    kern = functools.partial(_circle_loss_fused_kernel, **cfg)
    recall, loss = pl.pallas_call(
        kern,
        out_shape=(jax.ShapeDtypeStruct((1, 1), f32),
                   jax.ShapeDtypeStruct((1, 1), f32)),
        grid=(1,),
        in_specs=[pl.BlockSpec((p_block, 3), lambda i: (0, 0)),
                  pl.BlockSpec((3, p_block), lambda i: (0, 0)),
                  pl.BlockSpec((p_block, c), lambda i: (0, 0)),
                  pl.BlockSpec((p_block, c), lambda i: (0, 0)),
                  pl.BlockSpec((p_block, 1), lambda i: (0, 0)),
                  pl.BlockSpec((1, p_block), lambda i: (0, 0))],
        out_specs=(pl.BlockSpec((1, 1), lambda i: (0, 0)),
                   pl.BlockSpec((1, 1), lambda i: (0, 0))),
        compiler_params=pltpu.CompilerParams(
            dimension_semantics=("arbitrary",)),
    )(cs, ctT, fs, ft, vrow, vcol)
    return recall[0, 0], loss[0, 0]


# --------------------------------------------------------------------------
# CircleLoss module (forward semantics of the PyTorch reference)
# --------------------------------------------------------------------------
class CircleLossPallas:
    def __init__(self, args):
        cl = args['circle_loss']
        self.log_scale = float(cl['log_scale'])
        self.pos_optimal = float(cl['pos_optimal'])
        self.neg_optimal = float(cl['neg_optimal'])
        self.pos_margin = float(cl['pos_margin'])
        self.neg_margin = float(cl['neg_margin'])
        self.max_points = int(cl['max_points'])
        self.pos_radius = float(args['data']['voxel_size']) * 2.5
        self.safe_radius = float(args['data']['voxel_size']) * 4
        self.sample_points = 3036
        # fixed (lane/sublane aligned) block for the fused loss kernel
        self._p_block = _round_up(max(self.max_points, 8), 128)
        self._loss_cfg = dict(
            pos_radius=self.pos_radius, safe_radius=self.safe_radius,
            pos_optimal=self.pos_optimal, neg_optimal=self.neg_optimal,
            pos_margin=self.pos_margin, neg_margin=self.neg_margin,
            log_scale=self.log_scale)

    def __call__(self, feats_s, feats_t, coor_s, coor_t, pose_gt, key):
        # apply_tsfm (glue): rigid transform of source coords
        R = pose_gt[:3, :3]
        t = pose_gt[:3, 3]
        coor_s = coor_s @ R.T + t[None, :]

        n_source, n_target = feats_s.shape[0], feats_t.shape[0]
        k1, k2, k3 = jax.random.split(key, 3)
        choice_source = jax.random.permutation(k1, n_source)[:self.sample_points]
        choice_target = jax.random.permutation(k2, n_target)[:self.sample_points]
        feats_s_ego, coor_s_ego = feats_s[choice_source], coor_s[choice_source]
        feats_t_ego, coor_t_ego = feats_t[choice_target], coor_t[choice_target]

        # Kernel A: tiled, thresholded int8 mask (never materialises the f32 matrix)
        thresh_sq = (self.pos_radius - 0.001) ** 2
        sel_mask = candidate_pair_mask(coor_s_ego, coor_t_ego, thresh_sq)

        # data-dependent shape => eager JAX (not expressible as a Pallas grid)
        # TODO(synk): correspondence selection (nonzero + randperm gather) stays in eager XLA.
        src_idx, tgt_idx = jnp.where(sel_mask > 0)
        randperm = jax.random.permutation(k3, src_idx.shape[0])
        src_idx = src_idx[randperm][:self.max_points]
        tgt_idx = tgt_idx[randperm][:self.max_points]
        feats_s_sel, coor_s_sel = feats_s_ego[src_idx], coor_s_ego[src_idx]
        feats_t_sel, coor_t_sel = feats_t_ego[tgt_idx], coor_t_ego[tgt_idx]

        # Kernel B: fused coords/feats distances + circle loss + recall
        recall, circle_loss = circle_loss_and_recall(
            coor_s_sel, coor_t_sel, feats_s_sel, feats_t_sel,
            self._p_block, self._loss_cfg)
        return recall, circle_loss


# --------------------------------------------------------------------------
if __name__ == "__main__":
    # deterministic hyper-parameters (no learnable weights in this module)
    args = {
        'circle_loss': {
            'log_scale': 24.0,
            'pos_optimal': 0.1,
            'neg_optimal': 1.4,
            'pos_margin': 0.1,
            'neg_margin': 1.4,
            'max_points': 128,
        },
        'data': {
            'voxel_size': 0.3,   # pos_radius = 0.75, safe_radius = 1.2
        },
    }
    module = CircleLossPallas(args)

    key = jax.random.PRNGKey(0)
    k_fs, k_ft, k_cs, k_ct, k_fwd = jax.random.split(key, 5)

    N_SRC, N_TGT, C = 300, 280, 32
    feats_s = jax.random.normal(k_fs, (N_SRC, C), jnp.float32)
    feats_s = feats_s / jnp.linalg.norm(feats_s, axis=-1, keepdims=True)
    feats_t = jax.random.normal(k_ft, (N_TGT, C), jnp.float32)
    feats_t = feats_t / jnp.linalg.norm(feats_t, axis=-1, keepdims=True)
    coor_s = jax.random.uniform(k_cs, (N_SRC, 3), jnp.float32, 0.0, 3.0)
    coor_t = jax.random.uniform(k_ct, (N_TGT, 3), jnp.float32, 0.0, 3.0)

    # small rigid ground-truth pose (rotation about z + translation)
    theta = 0.1
    c, s = jnp.cos(theta), jnp.sin(theta)
    Rz = jnp.array([[c, -s, 0.0], [s, c, 0.0], [0.0, 0.0, 1.0]], jnp.float32)
    pose_gt = jnp.eye(4, dtype=jnp.float32)
    pose_gt = pose_gt.at[:3, :3].set(Rz)
    pose_gt = pose_gt.at[:3, 3].set(jnp.array([0.05, -0.03, 0.02], jnp.float32))

    recall, circle_loss = module(feats_s, feats_t, coor_s, coor_t, pose_gt, k_fwd)
    jax.block_until_ready((recall, circle_loss))
    print("KERNEL_OK")
</pallas_src>

<mosaic_0001>
module attributes {stable_mosaic.version = 11 : i64} {
  func.func @_cand_mask_kernel(%arg0: i32, %arg1: i32, %arg2: memref<320x3xf32, #tpu.memory_space<vmem>>, %arg3: memref<3x384xf32, #tpu.memory_space<vmem>>, %arg4: memref<320x384xi8, #tpu.memory_space<vmem>>) attributes {dimension_semantics = [#tpu.dimension_semantics<parallel>, #tpu.dimension_semantics<parallel>], iteration_bounds = array<i64: 1, 1>, scalar_prefetch = 0 : i64, scratch_operands = 0 : i64, tpu.core_type = #tpu.core_type<tc>, window_params = [{transform_indices = @transform_0, window_bounds = array<i64: 320, 3>}, {transform_indices = @transform_1, window_bounds = array<i64: 3, 384>}, {transform_indices = @transform_2, window_bounds = array<i64: 320, 384>}]} {
    %c0 = arith.constant 0 : index
    %c0_0 = arith.constant 0 : index
    %0 = vector.load %arg2[%c0, %c0_0] : memref<320x3xf32, #tpu.memory_space<vmem>>, vector<320x3xf32>
    %c0_1 = arith.constant 0 : index
    %c0_2 = arith.constant 0 : index
    %1 = vector.load %arg3[%c0_1, %c0_2] : memref<3x384xf32, #tpu.memory_space<vmem>>, vector<3x384xf32>
    %2 = vector.extract_strided_slice %0 {offsets = [0, 0], sizes = [320, 1], strides = [1, 1]} : vector<320x3xf32> to vector<320x1xf32>
    %3 = vector.extract_strided_slice %1 {offsets = [0, 0], sizes = [1, 384], strides = [1, 1]} : vector<3x384xf32> to vector<1x384xf32>
    %4 = vector.broadcast %2 : vector<320x1xf32> to vector<320x384xf32>
    %5 = vector.broadcast %3 : vector<1x384xf32> to vector<320x384xf32>
    %6 = arith.subf %4, %5 : vector<320x384xf32>
    %7 = vector.extract_strided_slice %0 {offsets = [0, 1], sizes = [320, 1], strides = [1, 1]} : vector<320x3xf32> to vector<320x1xf32>
    %8 = vector.extract_strided_slice %1 {offsets = [1, 0], sizes = [1, 384], strides = [1, 1]} : vector<3x384xf32> to vector<1x384xf32>
    %9 = vector.broadcast %7 : vector<320x1xf32> to vector<320x384xf32>
    %10 = vector.broadcast %8 : vector<1x384xf32> to vector<320x384xf32>
    %11 = arith.subf %9, %10 : vector<320x384xf32>
    %12 = vector.extract_strided_slice %0 {offsets = [0, 2], sizes = [320, 1], strides = [1, 1]} : vector<320x3xf32> to vector<320x1xf32>
    %13 = vector.extract_strided_slice %1 {offsets = [2, 0], sizes = [1, 384], strides = [1, 1]} : vector<3x384xf32> to vector<1x384xf32>
    %14 = vector.broadcast %12 : vector<320x1xf32> to vector<320x384xf32>
    %15 = vector.broadcast %13 : vector<1x384xf32> to vector<320x384xf32>
    %16 = arith.subf %14, %15 : vector<320x384xf32>
    %17 = arith.mulf %6, %6 : vector<320x384xf32>
    %18 = arith.mulf %11, %11 : vector<320x384xf32>
    %19 = arith.addf %17, %18 : vector<320x384xf32>
    %20 = arith.mulf %16, %16 : vector<320x384xf32>
    %21 = arith.addf %19, %20 : vector<320x384xf32>
    %cst = arith.constant 5.610010e-01 : f32
    %22 = vector.broadcast %cst : f32 to vector<320x384xf32>
    %23 = arith.cmpf olt, %21, %22 : vector<320x384xf32>
    %24 = arith.extui %23 : vector<320x384xi1> to vector<320x384xi8>
    %c0_3 = arith.constant 0 : index
    %c0_4 = arith.constant 0 : index
    %25 = vector.load %arg4[%c0_3, %c0_4] : memref<320x384xi8, #tpu.memory_space<vmem>>, vector<320x384xi8>
    tpu.vector_store %arg4[%c0_3, %c0_4], %24 {strides = array<i32>} : memref<320x384xi8, #tpu.memory_space<vmem>>, vector<320x384xi8>,
    return
  }
  func.func @transform_0(%arg0: i32, %arg1: i32) -> (i32, i32) {
    %c0_i32 = arith.constant 0 : i32
    %c0_i32_0 = arith.constant 0 : i32
    return %arg0, %c0_i32 : i32, i32
  }
  func.func @transform_1(%arg0: i32, %arg1: i32) -> (i32, i32) {
    %c0_i32 = arith.constant 0 : i32
    %c0_i32_0 = arith.constant 0 : i32
    return %c0_i32, %arg1 : i32, i32
  }
  func.func @transform_2(%arg0: i32, %arg1: i32) -> (i32, i32) {
    %c0_i32 = arith.constant 0 : i32
    return %arg0, %arg1 : i32, i32
  }
}

</mosaic_0001>

<bundles_post_ra>
// kernel: tpu_custom_call.1
= control target key start
LH: loop header
LB: loop body
LE: loop exit
PB: predicated region body
PF: predicated region fallthrough
CT: control target
= control target key end

     0   :  { %v3829_v2 = vmov 0   ;;  %s3826_s0 = inlined_call_operand.vmem [shape: f32[320,3], index: 0, kind: input, shape index: {}]   ;;  %s3827_s1 = inlined_call_operand.vmem [shape: f32[3,384], index: 1, kind: input, shape index: {}]   ;;  %s3828_s2 = inlined_call_operand.hbm [shape: s8[320,384], index: 2, kind: output, shape index: {}]  }
   0x1   :  { %v1967_v0 = vld [vmem:[%s3826_s0 + $0x10] sm:$0xff]  ;;  %v1972_v1 = vld [vmem:[%s3826_s0] sm:$0xff]  ;;  %1912 = vset.pattern.permute.xlu1 %v3829_v2  ;;  %1911 = vset.pattern.permute.xlu0 %v3829_v2  ;;  %v1981_v3 = vld [vmem:[%s3826_s0 + $0x18] sm:$0xff] }
   0x2   :  { %68 = vperm.xlu1 %1912, %v1967_v0   ;;  %58 = vperm.xlu0 %1911, %v1972_v1   ;;  %v1986_v4 = vld [vmem:[%s3826_s0 + $0x8] sm:$0xff]  ;;  %v1998_v6 = vld [vmem:[%s3826_s0 + $0x20] sm:$0xff]  ;;  %v2005_v7 = vld [vmem:[%s3826_s0 + $0x38] sm:$0xff] }
   0x3   :  { %v1993_v5 = vld [vmem:[%s3826_s0 + $0x28] sm:$0xff]  ;;  %v2010_v8 = vld [vmem:[%s3826_s0 + $0x30] sm:$0xff] }
   0x6   :  { %73 = vperm.xlu1 %1912, %v1981_v3   ;;  %63 = vperm.xlu0 %1911, %v1986_v4  }
   0xa   :  { %83 = vperm.xlu1 %1912, %v1993_v5   ;;  %78 = vperm.xlu0 %1911, %v1998_v6  }
   0xe   :  { %93 = vperm.xlu1 %1912, %v2005_v7   ;;  %88 = vperm.xlu0 %1911, %v2010_v8  }
   0xf   :  { %7 = vsyncpa [#allocation3], 0  ;;  %v2017_v9 = vld [vmem:[%s3826_s0 + $0x48] sm:$0xff]  ;;  %v2022_v10 = vld [vmem:[%s3826_s0 + $0x40] sm:$0xff]  ;;  %v1944_v41 = vmov 1   ;;  %v258_v42 = vlaneseq }
  0x10   :  { %v2029_v11 = vld [vmem:[%s3826_s0 + $0x58] sm:$0xff]  ;;  %v2034_v12 = vld [vmem:[%s3826_s0 + $0x50] sm:$0xff]  ;;  %v2041_v13 = vld [vmem:[%s3826_s0 + $0x68] sm:$0xff] }
  0x11   :  { %v2046_v14 = vld [vmem:[%s3826_s0 + $0x60] sm:$0xff]  ;;  %v2053_v15 = vld [vmem:[%s3826_s0 + $0x78] sm:$0xff]  ;;  %v2058_v16 = vld [vmem:[%s3826_s0 + $0x70] sm:$0xff]  ;;  %v2232_v45 = vshrl.u32 %v258_v42, 7 }
  0x12   :  { %103 = vperm.xlu1 %1912, %v2017_v9   ;;  %98 = vperm.xlu0 %1911, %v2022_v10   ;;  %v2065_v17 = vld [vmem:[%s3826_s0 + $0x88] sm:$0xff]  ;;  %v2070_v18 = vld [vmem:[%s3826_s0 + $0x80] sm:$0xff]  ;;  %v2077_v19 = vld [vmem:[%s3826_s0 + $0x98] sm:$0xff] }
  0x13   :  { %v2082_v20 = vld [vmem:[%s3826_s0 + $0x90] sm:$0xff]  ;;  %v2089_v21 = vld [vmem:[%s3826_s0 + $0xa8] sm:$0xff]  ;;  %v2094_v22 = vld [vmem:[%s3826_s0 + $0xa0] sm:$0xff]  ;;  %v260_v48 = vsub.s32 0, %v2232_v45  ;;  %v264_v49 = vsub.s32 4, %v2232_v45  ;;  %v567_v59 = vsub.s32 1, %v2232_v45 }
  0x14   :  { %v2101_v23 = vld [vmem:[%s3826_s0 + $0xb8] sm:$0xff]  ;;  %v2106_v24 = vld [vmem:[%s3826_s0 + $0xb0] sm:$0xff]  ;;  %v2113_v25 = vld [vmem:[%s3826_s0 + $0xc8] sm:$0xff]  ;;  %v571_v60 = vsub.s32 5, %v2232_v45 }
  0x15   :  { %3849 = vst [vmem:[#allocation5_spill] sm:$0xff] %v2101_v23  ;;  %3850 = vst [vmem:[#allocation6_spill] sm:$0xff] %v2113_v25  ;;  %v2118_v26 = vld [vmem:[%s3826_s0 + $0xc0] sm:$0xff]  ;;  %v2125_v27 = vld [vmem:[%s3826_s0 + $0xd8] sm:$0xff] }
  0x16   :  { %113 = vperm.xlu1 %1912, %v2029_v11   ;;  %108 = vperm.xlu0 %1911, %v2034_v12   ;;  %3851 = vst [vmem:[#allocation7_spill] sm:$0xff] %v2125_v27  ;;  %v2130_v28 = vld [vmem:[%s3826_s0 + $0xd0] sm:$0xff]  ;;  %v2137_v29 = vld [vmem:[%s3826_s0 + $0xe8] sm:$0xff]  ;;  %v2142_v30 = vld [vmem:[%s3826_s0 + $0xe0] sm:$0xff] }
  0x17   :  { %3852 = vst [vmem:[#allocation8_spill] sm:$0xff] %v2130_v28  ;;  %3853 = vst [vmem:[#allocation9_spill] sm:$0xff] %v2137_v29  ;;  %v2149_v31 = vld [vmem:[%s3826_s0 + $0xf8] sm:$0xff]  ;;  %v2154_v32 = vld [vmem:[%s3826_s0 + $0xf0] sm:$0xff] }
  0x18   :  { %3854 = vst [vmem:[#allocation10_spill] sm:$0xff] %v2142_v30  ;;  %3855 = vst [vmem:[#allocation11_spill] sm:$0xff] %v2149_v31  ;;  %v2161_v33 = vld [vmem:[%s3826_s0 + $0x108] sm:$0xff]  ;;  %v2166_v34 = vld [vmem:[%s3826_s0 + $0x100] sm:$0xff] }
  0x19   :  { %3856 = vst [vmem:[#allocation12_spill] sm:$0xff] %v2154_v32  ;;  %3857 = vst [vmem:[#allocation13_spill] sm:$0xff] %v2161_v33  ;;  %v2173_v35 = vld [vmem:[%s3826_s0 + $0x118] sm:$0xff]  ;;  %v2178_v36 = vld [vmem:[%s3826_s0 + $0x110] sm:$0xff] }
  0x1a   :  { %123 = vperm.xlu1 %1912, %v2041_v13   ;;  %118 = vperm.xlu0 %1911, %v2046_v14   ;;  %3858 = vst [vmem:[#allocation14_spill] sm:$0xff] %v2166_v34  ;;  %3859 = vst [vmem:[#allocation15_spill] sm:$0xff] %v2173_v35  ;;  %v2185_v37 = vld [vmem:[%s3826_s0 + $0x128] sm:$0xff]  ;;  %v2190_v38 = vld [vmem:[%s3826_s0 + $0x120] sm:$0xff] }
  0x1b   :  { %3860 = vst [vmem:[#allocation16_spill] sm:$0xff] %v2178_v36  ;;  %3861 = vst [vmem:[#allocation17_spill] sm:$0xff] %v2190_v38  ;;  %v2197_v39 = vld [vmem:[%s3826_s0 + $0x138] sm:$0xff]  ;;  %v2202_v40 = vld [vmem:[%s3826_s0 + $0x130] sm:$0xff] }
  0x1c   :  { %3862 = vst [vmem:[#allocation18_spill] sm:$0xff] %v2202_v40  ;;  %v2241_v50 = vld [vmem:[%s3827_s1] sm:$0x77]  ;;  %v2246_v53 = vld [vmem:[%s3827_s1 + $0x8] sm:$0x7] }
  0x1d   :  { %v261_v54 = vrot.slane %v2241_v50, %v260_v48  ;;  %v265_v55 = vrot.slane %v2241_v50, %v264_v49  ;;  %v269_v56 = vrot.slane %v2246_v53, %v260_v48  ;;  %v568_v49 = vrot.slane %v2241_v50, %v567_v59 }
  0x1e   :  { %133 = vperm.xlu1 %1912, %v2053_v15   ;;  %128 = vperm.xlu0 %1911, %v2058_v16   ;;  %v572_v2 = vrot.slane %v2241_v50, %v571_v60 }
  0x1f   :  { %v2261_v61 = vrot.slane %v261_v54, %v260_v48  ;;  %v2263_v62 = vrot.slane %v265_v55, %v260_v48  ;;  %v2265_v63 = vrot.slane %v269_v56, %v260_v48  ;;  %v576_v55 = vrot.slane %v2246_v53, %v567_v59 }
  0x20   :  { %v2287_v60 = vrot.slane %v568_v49, %v567_v59 }
  0x22   :  { %143 = vperm.xlu1 %1912, %v2065_v17   ;;  %138 = vperm.xlu0 %1911, %v2070_v18  }
  0x26   :  { %153 = vperm.xlu1 %1912, %v2077_v19   ;;  %148 = vperm.xlu0 %1911, %v2082_v20  }
  0x2a   :  { %163 = vperm.xlu1 %1912, %v2089_v21   ;;  %158 = vperm.xlu0 %1911, %v2094_v22  }
  0x2e   :  { %173 = vperm.xlu1 %1912, %v2101_v23   ;;  %168 = vperm.xlu0 %1911, %v2106_v24  }
  0x32   :  { %183 = vperm.xlu1 %1912, %v2113_v25   ;;  %178 = vperm.xlu0 %1911, %v2118_v26  }
  0x36   :  { %193 = vperm.xlu1 %1912, %v2125_v27   ;;  %188 = vperm.xlu0 %1911, %v2130_v28  }
  0x3a   :  { %203 = vperm.xlu1 %1912, %v2137_v29   ;;  %198 = vperm.xlu0 %1911, %v2142_v30  }
  0x3e   :  { %213 = vperm.xlu1 %1912, %v2149_v31   ;;  %208 = vperm.xlu0 %1911, %v2154_v32  }
  0x42   :  { %223 = vperm.xlu1 %1912, %v2161_v33   ;;  %218 = vperm.xlu0 %1911, %v2166_v34  }
  0x46   :  { %233 = vperm.xlu1 %1912, %v2173_v35   ;;  %228 = vperm.xlu0 %1911, %v2178_v36  }
  0x4a   :  { %243 = vperm.xlu1 %1912, %v2185_v37   ;;  %238 = vperm.xlu0 %1911, %v2190_v38  }
  0x4e   :  { %253 = vperm.xlu1 %1912, %v2197_v39   ;;  %248 = vperm.xlu0 %1911, %v2202_v40  }
  0x52   :  { %1914 = vset.pattern.permute.xlu1 %v1944_v41  ;;  %1913 = vset.pattern.permute.xlu0 %v1944_v41 }
  0x53   :  { %410 = vperm.xlu1 %1914, %v1986_v4   ;;  %406 = vperm.xlu0 %1913, %v1972_v1  }
  0x57   :  { %414 = vperm.xlu1 %1914, %v1967_v0   ;;  %418 = vperm.xlu0 %1913, %v1981_v3  }
  0x5b   :  { %422 = vperm.xlu1 %1914, %v1998_v6   ;;  %426 = vperm.xlu0 %1913, %v1993_v5  }
  0x5f   :  { %430 = vperm.xlu1 %1914, %v2010_v8   ;;  %434 = vperm.xlu0 %1913, %v2005_v7  }
  0x63   :  { %438 = vperm.xlu1 %1914, %v2022_v10   ;;  %442 = vperm.xlu0 %1913, %v2017_v9  }
  0x67   :  { %446 = vperm.xlu1 %1914, %v2034_v12   ;;  %450 = vperm.xlu0 %1913, %v2029_v11  }
  0x6b   :  { %454 = vperm.xlu1 %1914, %v2046_v14   ;;  %458 = vperm.xlu0 %1913, %v2041_v13  }
  0x6f   :  { %462 = vperm.xlu1 %1914, %v2058_v16   ;;  %466 = vperm.xlu0 %1913, %v2053_v15  }
  0x73   :  { %470 = vperm.xlu1 %1914, %v2070_v18   ;;  %474 = vperm.xlu0 %1913, %v2065_v17  }
  0x77   :  { %478 = vperm.xlu1 %1914, %v2082_v20   ;;  %482 = vperm.xlu0 %1913, %v2077_v19  }
  0x7b   :  { %486 = vperm.xlu1 %1914, %v2094_v22   ;;  %490 = vperm.xlu0 %1913, %v2089_v21  }
  0x7f   :  { %494 = vperm.xlu1 %1914, %v2106_v24   ;;  %498 = vperm.xlu0 %1913, %v2101_v23  }
  0x81   :  { %v69_v43 = vpop.permute.xlu1 %68  ;;  %v59_v44 = vpop.permute.xlu0 %58 }
  0x82   :  { %v292_v54 = vsub.f32 %v69_v43, %v2263_v62  ;;  %v293_v48 = vsub.f32 %v69_v43, %v2265_v63 }
  0x83   :  { %502 = vperm.xlu1 %1914, %v2118_v26   ;;  %506 = vperm.xlu0 %1913, %v2113_v25   ;;  %v2296_v25 = vrot.slane %v576_v55, %v567_v59 }
  0x85   :  { %v74_v46 = vpop.permute.xlu1 %73  ;;  %v64_v47 = vpop.permute.xlu0 %63  ;;  %3865 = vst [vmem:[#allocation21_spill] sm:$0xff] %v2296_v25 }
  0x86   :  { %v294_v23 = vsub.f32 %v74_v46, %v2261_v61  ;;  %v290_v55 = vsub.f32 %v64_v47, %v2265_v63 }
  0x87   :  { %510 = vperm.xlu1 %1914, %v2130_v28   ;;  %514 = vperm.xlu0 %1913, %v2125_v27   ;;  %v2298_v28 = vmul.f32 %v293_v48, %v293_v48 }
  0x89   :  { %v84_v51 = vpop.permute.xlu1 %83  ;;  %v79_v52 = vpop.permute.xlu0 %78  ;;  %3866 = vst [vmem:[#allocation22_spill] sm:$0xff] %v2298_v28 }
  0x8a   :  { %v300_v48 = vsub.f32 %v84_v51, %v2261_v61  ;;  %v301_v28 = vsub.f32 %v84_v51, %v2263_v62 }
  0x8b   :  { %518 = vperm.xlu1 %1914, %v2142_v30   ;;  %522 = vperm.xlu0 %1913, %v2137_v29   ;;  %v2293_v30 = vmul.f32 %v292_v54, %v292_v54 }
  0x8d   :  { %v2253_v57 = vpop.permute.xlu1 %93  ;;  %v2255_v58 = vpop.permute.xlu0 %88  ;;  %3864 = vst [vmem:[#allocation20_spill] sm:$0xff] %v2293_v30  ;;  %v298_v30 = vsub.f32 %v79_v52, %v2263_v62 }
  0x8f   :  { %526 = vperm.xlu1 %1914, %v2154_v32   ;;  %530 = vperm.xlu0 %1913, %v2149_v31   ;;  %v291_v31 = vsub.f32 %v69_v43, %v2261_v61  ;;  %v2289_v32 = vrot.slane %v572_v2, %v567_v59  ;;  %v287_v43 = vsub.f32 %v59_v44, %v2265_v63 }
  0x90   :  { %v289_v59 = vsub.f32 %v64_v47, %v2263_v62 }
  0x91   :  { %v2267_v41 = vpop.permute.xlu1 %103  ;;  %v2269_v42 = vpop.permute.xlu0 %98  ;;  %v2291_v27 = vmul.f32 %v291_v31, %v291_v31 }
  0x93   :  { %534 = vperm.xlu1 %1914, %v2166_v34   ;;  %538 = vperm.xlu0 %1913, %v2161_v33   ;;  %v285_v34 = vsub.f32 %v59_v44, %v2261_v61  ;;  %v286_v33 = vsub.f32 %v59_v44, %v2263_v62  ;;  %3863 = vst [vmem:[#allocation19_spill] sm:$0xff] %v2291_v27 }
  0x94   :  { %v288_v44 = vsub.f32 %v64_v47, %v2261_v61  ;;  %v2323_v27 = vmul.f32 %v294_v23, %v294_v23  ;;  %v307_v23 = vsub.f32 %v2253_v57, %v2263_v62 }
  0x95   :  { %v2279_v56 = vpop.permute.xlu1 %113  ;;  %v2281_v29 = vpop.permute.xlu0 %108  ;;  %v2307_v31 = vmul.f32 %v285_v34, %v285_v34  ;;  %v2309_v54 = vmul.f32 %v286_v33, %v286_v33  ;;  %v302_v34 = vsub.f32 %v84_v51, %v2265_v63  ;;  %v297_v33 = vsub.f32 %v79_v52, %v2261_v61 }
  0x96   :  { %3869 = vst [vmem:[#allocation25_spill] sm:$0xff] %v2323_v27  ;;  %v306_v51 = vsub.f32 %v2253_v57, %v2261_v61 }
  0x97   :  { %542 = vperm.xlu1 %1914, %v2178_v36   ;;  %546 = vperm.xlu0 %1913, %v2173_v35   ;;  %v295_v36 = vsub.f32 %v74_v46, %v2263_v62  ;;  %v296_v35 = vsub.f32 %v74_v46, %v2265_v63  ;;  %3867 = vst [vmem:[#allocation23_spill] sm:$0xff] %v2307_v31  ;;  %3868 = vst [vmem:[#allocation24_spill] sm:$0xff] %v2309_v54 }
  0x98   :  { %v2318_v46 = vmul.f32 %v287_v43, %v287_v43  ;;  %v299_v31 = vsub.f32 %v79_v52, %v2265_v63  ;;  %v2336_v43 = vmul.f32 %v289_v59, %v289_v59  ;;  %v2350_v52 = vmul.f32 %v302_v34, %v302_v34 }
  0x99   :  { %v2303_v49 = vpop.permute.xlu1 %123  ;;  %v2305_v2 = vpop.permute.xlu0 %118  ;;  %v2325_v54 = vmul.f32 %v295_v36, %v295_v36  ;;  %v2327_v47 = vmul.f32 %v296_v35, %v296_v35  ;;  %v2342_v36 = vmul.f32 %v290_v55, %v290_v55  ;;  %v2344_v35 = vmul.f32 %v300_v48, %v300_v48 }
  0x9a   :  { %3874 = vst [vmem:[#allocation30_spill] sm:$0xff] %v2350_v52  ;;  %v2354_v59 = vmul.f32 %v298_v30, %v298_v30  ;;  %v2358_v27 = vmul.f32 %v299_v31, %v299_v31  ;;  %v303_v55 = vsub.f32 %v2255_v58, %v2261_v61  ;;  %v2370_v30 = vmul.f32 %v306_v51, %v306_v51 }
  0x9b   :  { %550 = vperm.xlu1 %1914, %v2190_v38   ;;  %554 = vperm.xlu0 %1913, %v2185_v37   ;;  %3870 = vst [vmem:[#allocation26_spill] sm:$0xff] %v2325_v54  ;;  %3871 = vst [vmem:[#allocation27_spill] sm:$0xff] %v2327_v47  ;;  %v2334_v37 = vmul.f32 %v288_v44, %v288_v44  ;;  %v2346_v47 = vmul.f32 %v301_v28, %v301_v28 }
  0x9c   :  { %3872 = vst [vmem:[#allocation28_spill] sm:$0xff] %v2344_v35  ;;  %v2352_v44 = vmul.f32 %v297_v33, %v297_v33  ;;  %3875 = vst [vmem:[#allocation31_spill] sm:$0xff] %v2354_v59  ;;  %v308_v54 = vsub.f32 %v2253_v57, %v2265_v63  ;;  %v304_v28 = vsub.f32 %v2255_v58, %v2263_v62 }
  0x9d   :  { %v2330_v25 = vpop.permute.xlu1 %133  ;;  %v2332_v38 = vpop.permute.xlu0 %128  ;;  %3873 = vst [vmem:[#allocation29_spill] sm:$0xff] %v2346_v47  ;;  %3876 = vst [vmem:[#allocation32_spill] sm:$0xff] %v2358_v27  ;;  %v2372_v33 = vmul.f32 %v307_v23, %v307_v23  ;;  %v312_v57 = vsub.f32 %v2267_v41, %v2261_v61  ;;  %v313_v31 = vsub.f32 %v2267_v41, %v2263_v62  ;;  %v1945_v47 = vmov 2  }
  0x9e   :  { %3877 = vst [vmem:[#allocation33_spill] sm:$0xff] %v2370_v30  ;;  %v310_v52 = vsub.f32 %v2269_v42, %v2263_v62  ;;  %v2384_v51 = vmul.f32 %v308_v54, %v308_v54  ;;  %v311_v23 = vsub.f32 %v2269_v42, %v2265_v63  ;;  %v2393_v30 = vmul.f32 %v303_v55, %v303_v55 }
  0x9f   :  { %558 = vperm.xlu1 %1914, %v2202_v40   ;;  %562 = vperm.xlu0 %1913, %v2197_v39   ;;  %v305_v39 = vsub.f32 %v2255_v58, %v2265_v63  ;;  %3878 = vst [vmem:[#allocation34_spill] sm:$0xff] %v2372_v33  ;;  %v314_v40 = vsub.f32 %v2267_v41, %v2265_v63 }
  0xa0   :  { %v309_v58 = vsub.f32 %v2269_v42, %v2261_v61  ;;  %3879 = vst [vmem:[#allocation35_spill] sm:$0xff] %v2384_v51  ;;  %v318_v33 = vsub.f32 %v2279_v56, %v2261_v61  ;;  %v319_v41 = vsub.f32 %v2279_v56, %v2263_v62  ;;  %3880 = vst [vmem:[#allocation36_spill] sm:$0xff] %v2393_v30 }
  0xa1   :  { %v2366_v48 = vpop.permute.xlu1 %143  ;;  %v2368_v34 = vpop.permute.xlu0 %138  ;;  %v2395_v35 = vmul.f32 %v304_v28, %v304_v28  ;;  %v315_v54 = vsub.f32 %v2281_v29, %v2261_v61  ;;  %v2406_v27 = vmul.f32 %v305_v39, %v305_v39  ;;  %v2408_v59 = vmul.f32 %v312_v57, %v312_v57 }
  0xa2   :  { %v316_v55 = vsub.f32 %v2281_v29, %v2263_v62  ;;  %v2414_v28 = vmul.f32 %v314_v40, %v314_v40  ;;  %v2422_v30 = vmul.f32 %v311_v23, %v311_v23  ;;  %v2424_v39 = vmul.f32 %v318_v33, %v318_v33 }
  0xa3   :  { %1915 = vset.pattern.permute.xlu1 %v1945_v47  ;;  %1916 = vset.pattern.permute.xlu0 %v1945_v47  ;;  %3881 = vst [vmem:[#allocation37_spill] sm:$0xff] %v2395_v35  ;;  %v320_v47 = vsub.f32 %v2279_v56, %v2265_v63  ;;  %v2416_v56 = vmul.f32 %v309_v58, %v309_v58 }
  0xa4   :  { %713 = vperm.xlu1 %1915, %v1972_v1   ;;  %717 = vperm.xlu0 %1916, %v1986_v4   ;;  %v2410_v1 = vmul.f32 %v313_v31, %v313_v31  ;;  %3883 = vst [vmem:[#allocation39_spill] sm:$0xff] %v2414_v28  ;;  %v2418_v35 = vmul.f32 %v310_v52, %v310_v52  ;;  %3884 = vst [vmem:[#allocation40_spill] sm:$0xff] %v2424_v39 }
  0xa5   :  { %v2402_v42 = vpop.permute.xlu1 %153  ;;  %v2404_v51 = vpop.permute.xlu0 %148  ;;  %v317_v4 = vsub.f32 %v2281_v29, %v2265_v63  ;;  %v2426_v57 = vmul.f32 %v319_v41, %v319_v41  ;;  %v324_v31 = vsub.f32 %v2303_v49, %v2261_v61  ;;  %v2431_v40 = vmul.f32 %v320_v47, %v320_v47 }
  0xa6   :  { %3882 = vst [vmem:[#allocation38_spill] sm:$0xff] %v2410_v1  ;;  %v2433_v58 = vmul.f32 %v315_v54, %v315_v54  ;;  %v325_v52 = vsub.f32 %v2303_v49, %v2263_v62  ;;  %v326_v29 = vsub.f32 %v2303_v49, %v2265_v63  ;;  %v2442_v41 = vmul.f32 %v316_v55, %v316_v55 }
  0xa7   :  { %3885 = vst [vmem:[#allocation41_spill] sm:$0xff] %v2426_v57  ;;  %3886 = vst [vmem:[#allocation42_spill] sm:$0xff] %v2431_v40  ;;  %v322_v47 = vsub.f32 %v2305_v2, %v2263_v62  ;;  %v323_v54 = vsub.f32 %v2305_v2, %v2265_v63  ;;  %v2450_v40 = vmul.f32 %v317_v4, %v317_v4 }
  0xa8   :  { %721 = vperm.xlu1 %1915, %v1967_v0   ;;  %3887 = vst [vmem:[#allocation43_spill] sm:$0xff] %v2433_v58  ;;  %729 = vperm.xlu0 %1916, %v1998_v6   ;;  %3888 = vst [vmem:[#allocation44_spill] sm:$0xff] %v2442_v41  ;;  %v321_v0 = vsub.f32 %v2305_v2, %v2261_v61  ;;  %v330_v49 = vsub.f32 %v2330_v25, %v2261_v61 }
  0xa9   :  { %v164_v33 = vpop.permute.xlu1 %163  ;;  %v2440_v23 = vpop.permute.xlu0 %158  ;;  %3889 = vst [vmem:[#allocation45_spill] sm:$0xff] %v2450_v40  ;;  %v331_v6 = vsub.f32 %v2330_v25, %v2263_v62  ;;  %v332_v55 = vsub.f32 %v2330_v25, %v2265_v63  ;;  %v2458_v57 = vmul.f32 %v324_v31, %v324_v31  ;;  %v327_v39 = vsub.f32 %v2332_v38, %v2261_v61 }
  0xaa   :  { %v328_v41 = vsub.f32 %v2332_v38, %v2263_v62  ;;  %v329_v2 = vsub.f32 %v2332_v38, %v2265_v63  ;;  %v2467_v4 = vmul.f32 %v325_v52, %v325_v52  ;;  %v2469_v40 = vmul.f32 %v326_v29, %v326_v29 }
  0xab   :  { %3890 = vst [vmem:[#allocation46_spill] sm:$0xff] %v2458_v57  ;;  %v336_v25 = vsub.f32 %v2366_v48, %v2261_v61  ;;  %v337_v31 = vsub.f32 %v2366_v48, %v2263_v62  ;;  %v2478_v28 = vmul.f32 %v321_v0, %v321_v0  ;;  %v2480_v38 = vmul.f32 %v322_v47, %v322_v47 }
  0xac   :  { %725 = vperm.xlu1 %1915, %v1981_v3   ;;  %3891 = vst [vmem:[#allocation47_spill] sm:$0xff] %v2467_v4  ;;  %3892 = vst [vmem:[#allocation48_spill] sm:$0xff] %v2469_v40  ;;  %737 = vperm.xlu0 %1916, %v2010_v8   ;;  %v2482_v3 = vmul.f32 %v323_v54, %v323_v54  ;;  %v338_v52 = vsub.f32 %v2366_v48, %v2265_v63 }
  0xad   :  { %v174_v57 = vpop.permute.xlu1 %173  ;;  %v2476_v58 = vpop.permute.xlu0 %168  ;;  %v2486_v29 = vmul.f32 %v330_v49, %v330_v49  ;;  %v2488_v40 = vmul.f32 %v331_v6, %v331_v6  ;;  %v2490_v4 = vmul.f32 %v332_v55, %v332_v55  ;;  %v333_v8 = vsub.f32 %v2368_v34, %v2261_v61 }
  0xae   :  { %v2494_v1 = vmul.f32 %v327_v39, %v327_v39  ;;  %v2496_v0 = vmul.f32 %v328_v41, %v328_v41  ;;  %v2498_v47 = vmul.f32 %v329_v2, %v329_v2  ;;  %v334_v54 = vsub.f32 %v2368_v34, %v2263_v62 }
  0xaf   :  { %3893 = vst [vmem:[#allocation49_spill] sm:$0xff] %v2486_v29  ;;  %3894 = vst [vmem:[#allocation50_spill] sm:$0xff] %v2488_v40  ;;  %v2503_v48 = vmul.f32 %v336_v25, %v336_v25  ;;  %v2505_v49 = vmul.f32 %v337_v31, %v337_v31  ;;  %v335_v6 = vsub.f32 %v2368_v34, %v2265_v63 }
  0xb0   :  { %3895 = vst [vmem:[#allocation51_spill] sm:$0xff] %v2490_v4  ;;  %3896 = vst [vmem:[#allocation52_spill] sm:$0xff] %v2496_v0  ;;  %733 = vperm.xlu1 %1915, %v1993_v5   ;;  %v342_v39 = vsub.f32 %v2402_v42, %v2261_v61  ;;  %745 = vperm.xlu0 %1916, %v2022_v10   ;;  %v2512_v2 = vmul.f32 %v338_v52, %v338_v52 }
  0xb1   :  { %3897 = vst [vmem:[#allocation53_spill] sm:$0xff] %v2498_v47  ;;  %3898 = vst [vmem:[#allocation54_spill] sm:$0xff] %v2503_v48  ;;  %v184_v41 = vpop.permute.xlu1 %183  ;;  %v179_v55 = vpop.permute.xlu0 %178  ;;  %v343_v4 = vsub.f32 %v2402_v42, %v2263_v62  ;;  %v344_v5 = vsub.f32 %v2402_v42, %v2265_v63  ;;  %v339_v25 = vsub.f32 %v2404_v51, %v2261_v61  ;;  %v874_v42 = vsub.s32 2, %v2232_v45 }
  0xb2   :  { %3899 = vst [vmem:[#allocation55_spill] sm:$0xff] %v2505_v49  ;;  %3900 = vst [vmem:[#allocation56_spill] sm:$0xff] %v2512_v2  ;;  %v2520_v31 = vmul.f32 %v333_v8, %v333_v8  ;;  %v340_v34 = vsub.f32 %v2404_v51, %v2263_v62  ;;  %v341_v10 = vsub.f32 %v2404_v51, %v2265_v63  ;;  %v878_v47 = vsub.s32 6, %v2232_v45 }
  0xb3   :  { %v348_v52 = vsub.f32 %v164_v33, %v2261_v61  ;;  %v2527_v2 = vmul.f32 %v334_v54, %v334_v54  ;;  %v349_v49 = vsub.f32 %v164_v33, %v2263_v62  ;;  %v350_v48 = vsub.f32 %v164_v33, %v2265_v63 }
  0xb4   :  { %3901 = vst [vmem:[#allocation57_spill] sm:$0xff] %v2520_v31  ;;  %741 = vperm.xlu1 %1915, %v2005_v7   ;;  %v2533_v8 = vmul.f32 %v335_v6, %v335_v6  ;;  %v2535_v31 = vmul.f32 %v342_v39, %v342_v39  ;;  %v345_v40 = vsub.f32 %v2440_v23, %v2261_v61 }
  0xb5   :  { %3902 = vst [vmem:[#allocation58_spill] sm:$0xff] %v2527_v2  ;;  %v346_v51 = vsub.f32 %v2440_v23, %v2263_v62  ;;  %753 = vperm.xlu0 %1916, %v2034_v12   ;;  %v194_v54 = vpop.permute.xlu1 %193  ;;  %v189_v2 = vpop.permute.xlu0 %188  ;;  %v2542_v29 = vmul.f32 %v343_v4, %v343_v4  ;;  %v2544_v33 = vmul.f32 %v344_v5, %v344_v5 }
  0xb6   :  { %3903 = vst [vmem:[#allocation59_spill] sm:$0xff] %v2533_v8  ;;  %3904 = vst [vmem:[#allocation60_spill] sm:$0xff] %v2535_v31  ;;  %v2546_v7 = vmul.f32 %v339_v25, %v339_v25  ;;  %v347_v6 = vsub.f32 %v2440_v23, %v2265_v63  ;;  %v2550_v39 = vmul.f32 %v340_v34, %v340_v34 }
  0xb7   :  { %3905 = vst [vmem:[#allocation61_spill] sm:$0xff] %v2542_v29  ;;  %3906 = vst [vmem:[#allocation62_spill] sm:$0xff] %v2544_v33  ;;  %v2552_v31 = vmul.f32 %v341_v10, %v341_v10  ;;  %v2554_v8 = vmul.f32 %v348_v52, %v348_v52  ;;  %v2557_v12 = vmul.f32 %v349_v49, %v349_v49 }
  0xb8   :  { %v2559_v0 = vmul.f32 %v350_v48, %v350_v48  ;;  %v354_v4 = vsub.f32 %v174_v57, %v2261_v61  ;;  %749 = vperm.xlu1 %1915, %v2017_v9   ;;  %v875_v5 = vrot.slane %v2241_v50, %v874_v42  ;;  %v2564_v25 = vmul.f32 %v345_v40, %v345_v40 }
  0xb9   :  { %3907 = vst [vmem:[#allocation63_spill] sm:$0xff] %v2552_v31  ;;  %3908 = vst [vmem:[#allocation64_spill] sm:$0xff] %v2554_v8  ;;  %v2566_v23 = vmul.f32 %v346_v51, %v346_v51  ;;  %v355_v34 = vsub.f32 %v174_v57, %v2263_v62  ;;  %v356_v10 = vsub.f32 %v174_v57, %v2265_v63  ;;  %761 = vperm.xlu0 %1916, %v2046_v14   ;;  %v204_v45 = vpop.permute.xlu1 %203  ;;  %v199_v49 = vpop.permute.xlu0 %198 }
  0xba   :  { %3909 = vst [vmem:[#allocation65_spill] sm:$0xff] %v2557_v12  ;;  %3910 = vst [vmem:[#allocation66_spill] sm:$0xff] %v2559_v0  ;;  %v2571_v48 = vmul.f32 %v347_v6, %v347_v6  ;;  %v351_v52 = vsub.f32 %v2476_v58, %v2261_v61  ;;  %v352_v9 = vsub.f32 %v2476_v58, %v2263_v62 }
  0xbb   :  { %v353_v40 = vsub.f32 %v2476_v58, %v2265_v63  ;;  %v360_v51 = vsub.f32 %v184_v41, %v2261_v61  ;;  %v361_v0 = vsub.f32 %v184_v41, %v2263_v62  ;;  %v879_v57 = vrot.slane %v2241_v50, %v878_v47 }
  0xbc   :  { %v883_v14 = vrot.slane %v2246_v53, %v874_v42  ;;  %v2583_v12 = vmul.f32 %v354_v4, %v354_v4  ;;  %v362_v6 = vsub.f32 %v184_v41, %v2265_v63  ;;  %v357_v8 = vsub.f32 %v179_v55, %v2261_v61  ;;  %757 = vperm.xlu1 %1915, %v2029_v11  }
  0xbd   :  { %v2588_v33 = vrot.slane %v875_v5, %v874_v42  ;;  %v2590_v29 = vmul.f32 %v355_v34, %v355_v34  ;;  %v2592_v58 = vmul.f32 %v356_v10, %v356_v10  ;;  %v358_v31 = vsub.f32 %v179_v55, %v2263_v62  ;;  %769 = vperm.xlu0 %1916, %v2058_v16   ;;  %v214_v53 = vpop.permute.xlu1 %213  ;;  %v209_v47 = vpop.permute.xlu0 %208 }
  0xbe   :  { %3911 = vst [vmem:[#allocation67_spill] sm:$0xff] %v2583_v12  ;;  %v359_v50 = vsub.f32 %v179_v55, %v2265_v63  ;;  %v2597_v4 = vmul.f32 %v351_v52, %v351_v52  ;;  %v2599_v41 = vmul.f32 %v352_v9, %v352_v9  ;;  %v2601_v12 = vmul.f32 %v353_v40, %v353_v40 }
  0xbf   :  { %3912 = vst [vmem:[#allocation68_spill] sm:$0xff] %v2588_v33  ;;  %3913 = vst [vmem:[#allocation69_spill] sm:$0xff] %v2590_v29  ;;  %v366_v11 = vsub.f32 %v194_v54, %v2261_v61  ;;  %v2604_v5 = vmul.f32 %v360_v51, %v360_v51  ;;  %v2606_v34 = vmul.f32 %v361_v0, %v361_v0 }
  0xc0   :  { %3914 = vst [vmem:[#allocation70_spill] sm:$0xff] %v2592_v58  ;;  %v2608_v10 = vrot.slane %v879_v57, %v874_v42  ;;  %v2610_v58 = vrot.slane %v883_v14, %v874_v42  ;;  %v2612_v55 = vmul.f32 %v362_v6, %v362_v6  ;;  %v2614_v16 = vmul.f32 %v357_v8, %v357_v8 }
  0xc1   :  { %v367_v52 = vsub.f32 %v194_v54, %v2263_v62  ;;  %v368_v9 = vsub.f32 %v194_v54, %v2265_v63  ;;  %765 = vperm.xlu1 %1915, %v2041_v13   ;;  %v2619_v40 = vmul.f32 %v358_v31, %v358_v31  ;;  %v2621_v51 = vmul.f32 %v359_v50, %v359_v50  ;;  %v224_v42 = vpop.permute.xlu1 %223  ;;  %v219_v14 = vpop.permute.xlu0 %218 }
  0xc2   :  { %3915 = vst [vmem:[#allocation71_spill] sm:$0xff] %v2608_v10  ;;  %3916 = vst [vmem:[#allocation72_spill] sm:$0xff] %v2610_v58  ;;  %v363_v0 = vsub.f32 %v189_v2, %v2261_v61  ;;  %v364_v57 = vsub.f32 %v189_v2, %v2263_v62  ;;  %777 = vperm.xlu0 %1916, %v2070_v18   ;;  %v2626_v8 = vmul.f32 %v366_v11, %v366_v11 }
  0xc3   :  { %3917 = vst [vmem:[#allocation73_spill] sm:$0xff] %v2612_v55  ;;  %v365_v6 = vsub.f32 %v189_v2, %v2265_v63  ;;  %v372_v54 = vsub.f32 %v204_v45, %v2261_v61  ;;  %v373_v13 = vsub.f32 %v204_v45, %v2263_v62  ;;  %v374_v31 = vsub.f32 %v204_v45, %v2265_v63 }
  0xc4   :  { %3918 = vst [vmem:[#allocation74_spill] sm:$0xff] %v2626_v8  ;;  %v369_v50 = vsub.f32 %v199_v49, %v2261_v61  ;;  %v370_v29 = vsub.f32 %v199_v49, %v2263_v62  ;;  %v371_v58 = vsub.f32 %v199_v49, %v2265_v63  ;;  %v2635_v10 = vmul.f32 %v367_v52, %v367_v52 }
  0xc5   :  { %v2637_v18 = vmul.f32 %v368_v9, %v368_v9  ;;  %v378_v11 = vsub.f32 %v214_v53, %v2261_v61  ;;  %v379_v2 = vsub.f32 %v214_v53, %v2263_v62  ;;  %773 = vperm.xlu1 %1915, %v2053_v15   ;;  %v2642_v33 = vmul.f32 %v363_v0, %v363_v0  ;;  %v234_v49 = vpop.permute.xlu1 %233  ;;  %v229_v52 = vpop.permute.xlu0 %228 }
  0xc6   :  { %3919 = vst [vmem:[#allocation75_spill] sm:$0xff] %v2635_v10  ;;  %v2644_v8 = vmul.f32 %v364_v57, %v364_v57  ;;  %v380_v45 = vsub.f32 %v214_v53, %v2265_v63  ;;  %v375_v55 = vsub.f32 %v209_v47, %v2261_v61  ;;  %785 = vperm.xlu0 %1916, %v2082_v20  }
  0xc7   :  { %3920 = vst [vmem:[#allocation76_spill] sm:$0xff] %v2637_v18  ;;  %3921 = vst [vmem:[#allocation77_spill] sm:$0xff] %v2642_v33  ;;  %v2649_v9 = vmul.f32 %v365_v6, %v365_v6  ;;  %v2651_v18 = vmul.f32 %v372_v54, %v372_v54  ;;  %v2653_v10 = vmul.f32 %v373_v13, %v373_v13 }
  0xc8   :  { %3922 = vst [vmem:[#allocation78_spill] sm:$0xff] %v2644_v8  ;;  %v376_v15 = vsub.f32 %v209_v47, %v2263_v62  ;;  %v2656_v0 = vmul.f32 %v374_v31, %v374_v31  ;;  %v2658_v57 = vmul.f32 %v369_v50, %v369_v50  ;;  %v2660_v8 = vmul.f32 %v370_v29, %v370_v29 }
  0xc9   :  { %3923 = vst [vmem:[#allocation79_spill] sm:$0xff] %v2653_v10  ;;  %v2662_v53 = vmul.f32 %v371_v58, %v371_v58  ;;  %v2664_v33 = vmul.f32 %v378_v11, %v378_v11  ;;  %v2666_v20 = vmul.f32 %v379_v2, %v379_v2  ;;  %v377_v6 = vsub.f32 %v209_v47, %v2265_v63  ;;  %v244_v58 = vpop.permute.xlu1 %243  ;;  %v239_v11 = vpop.permute.xlu0 %238 }
  0xca   :  { %3924 = vst [vmem:[#allocation80_spill] sm:$0xff] %v2656_v0  ;;  %v384_v54 = vsub.f32 %v224_v42, %v2261_v61  ;;  %781 = vperm.xlu1 %1915, %v2065_v17   ;;  %v2671_v13 = vmul.f32 %v380_v45, %v380_v45  ;;  %v2673_v31 = vmul.f32 %v375_v55, %v375_v55 }
  0xcb   :  { %3925 = vst [vmem:[#allocation81_spill] sm:$0xff] %v2664_v33  ;;  %3926 = vst [vmem:[#allocation82_spill] sm:$0xff] %v2666_v20  ;;  %v385_v50 = vsub.f32 %v224_v42, %v2263_v62  ;;  %v386_v29 = vsub.f32 %v224_v42, %v2265_v63  ;;  %793 = vperm.xlu0 %1916, %v2094_v22   ;;  %v2678_v2 = vmul.f32 %v376_v15, %v376_v15 }
  0xcc   :  { %3927 = vst [vmem:[#allocation83_spill] sm:$0xff] %v2671_v13  ;;  %3928 = vst [vmem:[#allocation84_spill] sm:$0xff] %v2673_v31  ;;  %v381_v47 = vsub.f32 %v219_v14, %v2261_v61  ;;  %v382_v20 = vsub.f32 %v219_v14, %v2263_v62  ;;  %v383_v17 = vsub.f32 %v219_v14, %v2265_v63 }
  0xcd   :  { %3929 = vst [vmem:[#allocation85_spill] sm:$0xff] %v2678_v2  ;;  %v390_v45 = vsub.f32 %v234_v49, %v2261_v61  ;;  %v391_v55 = vsub.f32 %v234_v49, %v2263_v62  ;;  %v392_v13 = vsub.f32 %v234_v49, %v2265_v63  ;;  %v387_v42 = vsub.f32 %v229_v52, %v2261_v61 }
  0xce   :  { %v2687_v33 = vmul.f32 %v377_v6, %v377_v6  ;;  %v2689_v22 = vmul.f32 %v384_v54, %v384_v54  ;;  %v388_v15 = vsub.f32 %v229_v52, %v2263_v62  ;;  %v389_v2 = vsub.f32 %v229_v52, %v2265_v63  ;;  %789 = vperm.xlu1 %1915, %v2077_v19   ;;  %v254_v6 = vpop.permute.xlu1 %253 }
  0xcf   :  { %v2694_v31 = vmul.f32 %v385_v50, %v385_v50  ;;  %v2696_v14 = vmul.f32 %v386_v29, %v386_v29  ;;  %v396_v0 = vsub.f32 %v244_v58, %v2261_v61  ;;  %v397_v49 = vsub.f32 %v244_v58, %v2263_v62  ;;  %801 = vperm.xlu0 %1916, %v2106_v24  }
  0xd0   :  { %3930 = vst [vmem:[#allocation86_spill] sm:$0xff] %v2687_v33  ;;  %3931 = vst [vmem:[#allocation87_spill] sm:$0xff] %v2689_v22  ;;  %v249_v33 = vpop.permute.xlu0 %248  ;;  %v2701_v54 = vmul.f32 %v381_v47, %v381_v47  ;;  %v2703_v22 = vmul.f32 %v382_v20, %v382_v20  ;;  %v2705_v10 = vmul.f32 %v383_v17, %v383_v17 }
  0xd1   :  { %3932 = vst [vmem:[#allocation88_spill] sm:$0xff] %v2694_v31  ;;  %3933 = vst [vmem:[#allocation89_spill] sm:$0xff] %v2696_v14  ;;  %v398_v19 = vsub.f32 %v244_v58, %v2265_v63  ;;  %v2708_v52 = vmul.f32 %v390_v45, %v390_v45  ;;  %v2710_v50 = vmul.f32 %v391_v55, %v391_v55 }
  0xd2   :  { %3934 = vst [vmem:[#allocation90_spill] sm:$0xff] %v2703_v22  ;;  %3935 = vst [vmem:[#allocation91_spill] sm:$0xff] %v2705_v10  ;;  %v2712_v29 = vmul.f32 %v392_v13, %v392_v13  ;;  %v2714_v14 = vmul.f32 %v387_v42, %v387_v42  ;;  %v2716_v31 = vmul.f32 %v388_v15, %v388_v15  ;;  %797 = vperm.xlu1 %1915, %v2089_v21  }
  0xd3   :  { %3936 = vst [vmem:[#allocation92_spill] sm:$0xff] %v2708_v52  ;;  %3937 = vst [vmem:[#allocation93_spill] sm:$0xff] %v2710_v50  ;;  %v2718_v24 = vmul.f32 %v389_v2, %v389_v2  ;;  %v393_v47 = vsub.f32 %v239_v11, %v2261_v61  ;;  %v394_v20 = vsub.f32 %v239_v11, %v2263_v62  ;;  %809 = vperm.xlu0 %1916, %v2118_v26  }
  0xd4   :  { %3938 = vst [vmem:[#allocation94_spill] sm:$0xff] %v2712_v29  ;;  %3939 = vst [vmem:[#allocation95_spill] sm:$0xff] %v2714_v14  ;;  %v2723_v17 = vmul.f32 %v396_v0, %v396_v0  ;;  %v2725_v58 = vmul.f32 %v397_v49, %v397_v49  ;;  %v395_v45 = vsub.f32 %v239_v11, %v2265_v63  ;;  %v411_v29 = vpop.permute.xlu1 %410  ;;  %v407_v21 = vpop.permute.xlu0 %406 }
  0xd5   :  { %3940 = vst [vmem:[#allocation96_spill] sm:$0xff] %v2716_v31  ;;  %3941 = vst [vmem:[#allocation97_spill] sm:$0xff] %v2718_v24  ;;  %v402_v13 = vsub.f32 %v254_v6, %v2261_v61  ;;  %v2730_v55 = vmul.f32 %v398_v19, %v398_v19  ;;  %v403_v2 = vsub.f32 %v254_v6, %v2263_v62  ;;  %v3950_v31 = vld [vmem:[#allocation8_spill] sm:$0xff] }
  0xd6   :  { %3942 = vst [vmem:[#allocation98_spill] sm:$0xff] %v2723_v17  ;;  %3943 = vst [vmem:[#allocation99_spill] sm:$0xff] %v2725_v58  ;;  %v404_v42 = vsub.f32 %v254_v6, %v2265_v63  ;;  %v399_v15 = vsub.f32 %v249_v33, %v2261_v61  ;;  %v595_v0 = vsub.f32 %v411_v29, %v2287_v60  ;;  %v3945_v58 = vld [vmem:[#allocation21_spill] sm:$0xff] }
  0xd7   :  { %3944 = vst [vmem:[#allocation100_spill] sm:$0xff] %v2730_v55  ;;  %v596_v49 = vsub.f32 %v411_v29, %v2289_v32  ;;  %v597_v11 = vsub.f32 %v411_v29, %v3945_v58  ;;  %v592_v17 = vsub.f32 %v407_v21, %v2287_v60  ;;  %v2739_v50 = vmul.f32 %v393_v47, %v393_v47  ;;  %v3947_v55 = vld [vmem:[#allocation5_spill] sm:$0xff] }
  0xd8   :  { %v400_v26 = vsub.f32 %v249_v33, %v2263_v62  ;;  %v593_v19 = vsub.f32 %v407_v21, %v2289_v32  ;;  %v594_v6 = vsub.f32 %v407_v21, %v3945_v58  ;;  %805 = vperm.xlu1 %1915, %v3947_v55   ;;  %v2745_v61 = vmul.f32 %v394_v20, %v394_v20  ;;  %v415_v10 = vpop.permute.xlu1 %414  ;;  %v419_v21 = vpop.permute.xlu0 %418 }
  0xd9   :  { %3946 = vst [vmem:[#allocation21_spill] sm:$0xff] %v2739_v50  ;;  %v2747_v52 = vmul.f32 %v395_v45, %v395_v45  ;;  %v2749_v24 = vmul.f32 %v402_v13, %v402_v13  ;;  %v401_v29 = vsub.f32 %v249_v33, %v2265_v63  ;;  %817 = vperm.xlu0 %1916, %v3950_v31   ;;  %v3953_v31 = vld [vmem:[#allocation6_spill] sm:$0xff] }
  0xda   :  { %v2753_v47 = vmul.f32 %v403_v2, %v403_v2  ;;  %v2755_v50 = vmul.f32 %v404_v42, %v404_v42  ;;  %v1142_v62 = vmul.f32 %v595_v0, %v595_v0  ;;  %v1143_v14 = vmul.f32 %v596_v49, %v596_v49  ;;  %v3954_v49 = vld [vmem:[#allocation10_spill] sm:$0xff] }
  0xdb   :  { %3948 = vst [vmem:[#allocation5_spill] sm:$0xff] %v2747_v52  ;;  %3949 = vst [vmem:[#allocation101_spill] sm:$0xff] %v2749_v24  ;;  %v2757_v22 = vmul.f32 %v399_v15, %v399_v15  ;;  %v1144_v20 = vmul.f32 %v597_v11, %v597_v11  ;;  %v1139_v55 = vmul.f32 %v592_v17, %v592_v17 }
  0xdc   :  { %3951 = vst [vmem:[#allocation8_spill] sm:$0xff] %v2753_v47  ;;  %3952 = vst [vmem:[#allocation102_spill] sm:$0xff] %v2755_v50  ;;  %v1140_v45 = vmul.f32 %v593_v19, %v593_v19  ;;  %v2759_v52 = vmul.f32 %v400_v26, %v400_v26  ;;  %v1141_v13 = vmul.f32 %v594_v6, %v594_v6  ;;  %813 = vperm.xlu1 %1915, %v3953_v31   ;;  %v423_v6 = vpop.permute.xlu1 %422  ;;  %v427_v31 = vpop.permute.xlu0 %426  ;;  %v3959_v50 = vld [vmem:[#allocation23_spill] sm:$0xff] }
  0xdd   :  { %v598_v63 = vsub.f32 %v415_v10, %v2287_v60  ;;  %v599_v33 = vsub.f32 %v415_v10, %v2289_v32  ;;  %v600_v2 = vsub.f32 %v415_v10, %v3945_v58  ;;  %v601_v42 = vsub.f32 %v419_v21, %v2287_v60  ;;  %825 = vperm.xlu0 %1916, %v3954_v49  }
  0xde   :  { %v602_v0 = vsub.f32 %v419_v21, %v2289_v32  ;;  %v603_v15 = vsub.f32 %v419_v21, %v3945_v58  ;;  %v2769_v17 = vmul.f32 %v401_v29, %v401_v29  ;;  %v2772_v11 = vadd.f32 %v1142_v62, %v2334_v37  ;;  %v3961_v21 = vld [vmem:[#allocation24_spill] sm:$0xff] }
  0xdf   :  { %v2775_v26 = vadd.f32 %v1143_v14, %v2336_v43  ;;  %v1145_v19 = vmul.f32 %v598_v63, %v598_v63  ;;  %v2778_v10 = vadd.f32 %v1144_v20, %v2342_v36  ;;  %v2781_v47 = vadd.f32 %v1139_v55, %v3959_v50  ;;  %v3963_v14 = vld [vmem:[#allocation7_spill] sm:$0xff]  ;;  %v3967_v63 = vld [vmem:[#allocation12_spill] sm:$0xff] }
  0xe0   :  { %3955 = vst [vmem:[#allocation6_spill] sm:$0xff] %v2769_v17  ;;  %3956 = vst [vmem:[#allocation10_spill] sm:$0xff] %v2772_v11  ;;  %v2784_v24 = vadd.f32 %v1140_v45, %v3961_v21  ;;  %v1146_v29 = vmul.f32 %v599_v33, %v599_v33  ;;  %v1147_v49 = vmul.f32 %v600_v2, %v600_v2  ;;  %821 = vperm.xlu1 %1915, %v3963_v14   ;;  %v3965_v36 = vld [vmem:[#allocation19_spill] sm:$0xff]  ;;  %v431_v21 = vpop.permute.xlu1 %430 }
  0xe1   :  { %3957 = vst [vmem:[#allocation103_spill] sm:$0xff] %v2775_v26  ;;  %3958 = vst [vmem:[#allocation104_spill] sm:$0xff] %v2778_v10  ;;  %v1148_v17 = vmul.f32 %v601_v42, %v601_v42  ;;  %v604_v37 = vsub.f32 %v423_v6, %v2287_v60  ;;  %v605_v43 = vsub.f32 %v423_v6, %v2289_v32  ;;  %833 = vperm.xlu0 %1916, %v3967_v63   ;;  %v435_v10 = vpop.permute.xlu0 %434  ;;  %v3973_v26 = vld [vmem:[#allocation26_spill] sm:$0xff] }
  0xe2   :  { %3960 = vst [vmem:[#allocation23_spill] sm:$0xff] %v2781_v47  ;;  %3962 = vst [vmem:[#allocation24_spill] sm:$0xff] %v2784_v24  ;;  %v2790_v62 = vadd.f32 %v1141_v13, %v2318_v46  ;;  %v2793_v20 = vadd.f32 %v1145_v19, %v3965_v36  ;;  %v1149_v50 = vmul.f32 %v602_v0, %v602_v0  ;;  %v3968_v0 = vld [vmem:[#allocation20_spill] sm:$0xff]  ;;  %v3969_v36 = vld [vmem:[#allocation22_spill] sm:$0xff] }
  0xe3   :  { %v1150_v55 = vmul.f32 %v603_v15, %v603_v15  ;;  %v606_v45 = vsub.f32 %v423_v6, %v3945_v58  ;;  %v1151_v33 = vmul.f32 %v604_v37, %v604_v37  ;;  %v1152_v2 = vmul.f32 %v605_v43, %v605_v43  ;;  %v3970_v6 = vld [vmem:[#allocation25_spill] sm:$0xff] }
  0xe4   :  { %3964 = vst [vmem:[#allocation7_spill] sm:$0xff] %v2790_v62  ;;  %3966 = vst [vmem:[#allocation19_spill] sm:$0xff] %v2793_v20  ;;  %v607_v42 = vsub.f32 %v427_v31, %v2287_v60  ;;  %v608_v14 = vsub.f32 %v427_v31, %v2289_v32  ;;  %v609_v46 = vsub.f32 %v427_v31, %v3945_v58  ;;  %v3972_v20 = vld [vmem:[#allocation9_spill] sm:$0xff]  ;;  %v3975_v31 = vld [vmem:[#allocation27_spill] sm:$0xff] }
  0xe5   :  { %v610_v13 = vsub.f32 %v431_v21, %v2287_v60  ;;  %v611_v19 = vsub.f32 %v431_v21, %v2289_v32  ;;  %v2803_v15 = vadd.f32 %v1146_v29, %v3968_v0  ;;  %v2806_v63 = vadd.f32 %v1147_v49, %v3969_v36  ;;  %829 = vperm.xlu1 %1915, %v3972_v20   ;;  %v3977_v29 = vld [vmem:[#allocation14_spill] sm:$0xff]  ;;  %v439_v36 = vpop.permute.xlu1 %438  ;;  %v443_v20 = vpop.permute.xlu0 %442 }
  0xe6   :  { %v2809_v37 = vadd.f32 %v1148_v17, %v3970_v6  ;;  %v1153_v43 = vmul.f32 %v606_v45, %v606_v45  ;;  %v2813_v11 = vadd.f32 %v1149_v50, %v3973_v26  ;;  %v2816_v62 = vadd.f32 %v1150_v55, %v3975_v31  ;;  %841 = vperm.xlu0 %1916, %v3977_v29   ;;  %v3978_v6 = vld [vmem:[#allocation31_spill] sm:$0xff]  ;;  %v3979_v50 = vld [vmem:[#allocation32_spill] sm:$0xff] }
  0xe7   :  { %v1154_v24 = vmul.f32 %v607_v42, %v607_v42  ;;  %v612_v47 = vsub.f32 %v431_v21, %v3945_v58  ;;  %v2821_v49 = vadd.f32 %v1151_v33, %v2352_v44  ;;  %v1155_v0 = vmul.f32 %v608_v14, %v608_v14  ;;  %v3981_v14 = vld [vmem:[#allocation11_spill] sm:$0xff] }
  0xe8   :  { %3971 = vst [vmem:[#allocation12_spill] sm:$0xff] %v2809_v37  ;;  %3974 = vst [vmem:[#allocation20_spill] sm:$0xff] %v2813_v11  ;;  %v1156_v17 = vmul.f32 %v609_v46, %v609_v46  ;;  %v613_v45 = vsub.f32 %v435_v10, %v2287_v60  ;;  %v2825_v26 = vadd.f32 %v1152_v2, %v3978_v6  ;;  %v3982_v46 = vld [vmem:[#allocation28_spill] sm:$0xff]  ;;  %v3991_v37 = vld [vmem:[#allocation37_spill] sm:$0xff] }
  0xe9   :  { %3976 = vst [vmem:[#allocation22_spill] sm:$0xff] %v2816_v62  ;;  %v2828_v55 = vadd.f32 %v1153_v43, %v3979_v50  ;;  %v1157_v42 = vmul.f32 %v610_v13, %v610_v13  ;;  %v1158_v31 = vmul.f32 %v611_v19, %v611_v19  ;;  %v1159_v21 = vmul.f32 %v612_v47, %v612_v47  ;;  %v3984_v6 = vld [vmem:[#allocation16_spill] sm:$0xff]  ;;  %v3985_v13 = vld [vmem:[#allocation29_spill] sm:$0xff]  ;;  %v3987_v19 = vld [vmem:[#allocation30_spill] sm:$0xff] }
  0xea   :  { %v614_v29 = vsub.f32 %v435_v10, %v2289_v32  ;;  %v615_v44 = vsub.f32 %v435_v10, %v3945_v58  ;;  %v1160_v33 = vmul.f32 %v613_v45, %v613_v45  ;;  %837 = vperm.xlu1 %1915, %v3981_v14   ;;  %v2834_v62 = vadd.f32 %v1154_v24, %v3982_v46  ;;  %v447_v14 = vpop.permute.xlu1 %446  ;;  %v451_v24 = vpop.permute.xlu0 %450  ;;  %v3989_v46 = vld [vmem:[#allocation36_spill] sm:$0xff] }
  0xeb   :  { %3980 = vst [vmem:[#allocation25_spill] sm:$0xff] %v2828_v55  ;;  %v616_v11 = vsub.f32 %v439_v36, %v2287_v60  ;;  %v617_v2 = vsub.f32 %v439_v36, %v2289_v32  ;;  %v618_v43 = vsub.f32 %v439_v36, %v3945_v58  ;;  %849 = vperm.xlu0 %1916, %v3984_v6  }
  0xec   :  { %3983 = vst [vmem:[#allocation9_spill] sm:$0xff] %v2834_v62  ;;  %v2841_v47 = vadd.f32 %v1155_v0, %v3985_v13  ;;  %v2844_v50 = vadd.f32 %v1156_v17, %v3987_v19  ;;  %v1161_v10 = vmul.f32 %v614_v29, %v614_v29  ;;  %v619_v45 = vsub.f32 %v443_v20, %v2287_v60  ;;  %v3993_v13 = vld [vmem:[#allocation33_spill] sm:$0xff] }
  0xed   :  { %v2848_v62 = vadd.f32 %v1157_v42, %v3989_v46  ;;  %v2851_v55 = vadd.f32 %v1158_v31, %v3991_v37  ;;  %v1162_v36 = vmul.f32 %v615_v44, %v615_v44  ;;  %v620_v6 = vsub.f32 %v443_v20, %v2289_v32  ;;  %v3998_v44 = vld [vmem:[#allocation17_spill] sm:$0xff] }
  0xee   :  { %3986 = vst [vmem:[#allocation26_spill] sm:$0xff] %v2841_v47  ;;  %3988 = vst [vmem:[#allocation27_spill] sm:$0xff] %v2844_v50  ;;  %v2855_v0 = vadd.f32 %v1159_v21, %v2406_v27  ;;  %v2858_v17 = vadd.f32 %v1160_v33, %v3993_v13  ;;  %v1163_v29 = vmul.f32 %v616_v11, %v616_v11  ;;  %v3995_v50 = vld [vmem:[#allocation13_spill] sm:$0xff]  ;;  %v3996_v47 = vld [vmem:[#allocation34_spill] sm:$0xff]  ;;  %v455_v33 = vpop.permute.xlu1 %454  ;;  %v459_v11 = vpop.permute.xlu0 %458 }
  0xef   :  { %3990 = vst [vmem:[#allocation14_spill] sm:$0xff] %v2848_v62  ;;  %3992 = vst [vmem:[#allocation31_spill] sm:$0xff] %v2851_v55  ;;  %v621_v19 = vsub.f32 %v443_v20, %v3945_v58  ;;  %845 = vperm.xlu1 %1915, %v3995_v50   ;;  %v2863_v42 = vadd.f32 %v1161_v10, %v3996_v47  ;;  %v1164_v46 = vmul.f32 %v617_v2, %v617_v2  ;;  %v3999_v13 = vld [vmem:[#allocation35_spill] sm:$0xff] }
  0xf0   :  { %3994 = vst [vmem:[#allocation32_spill] sm:$0xff] %v2858_v17  ;;  %v1165_v37 = vmul.f32 %v618_v43, %v618_v43  ;;  %v1166_v31 = vmul.f32 %v619_v45, %v619_v45  ;;  %857 = vperm.xlu0 %1916, %v3998_v44   ;;  %v1167_v55 = vmul.f32 %v620_v6, %v620_v6  ;;  %v4016_v17 = vld [vmem:[#allocation41_spill] sm:$0xff] }
  0xf1   :  { %3997 = vst [vmem:[#allocation11_spill] sm:$0xff] %v2863_v42  ;;  %v1168_v62 = vmul.f32 %v621_v19, %v621_v19  ;;  %v622_v27 = vsub.f32 %v447_v14, %v2287_v60  ;;  %v623_v21 = vsub.f32 %v447_v14, %v2289_v32  ;;  %v2869_v20 = vadd.f32 %v1162_v36, %v3999_v13  ;;  %v4001_v19 = vld [vmem:[#allocation15_spill] sm:$0xff]  ;;  %v4012_v42 = vld [vmem:[#allocation44_spill] sm:$0xff] }
  0xf2   :  { %v624_v50 = vsub.f32 %v447_v14, %v3945_v58  ;;  %v625_v47 = vsub.f32 %v451_v24, %v2287_v60  ;;  %v626_v2 = vsub.f32 %v451_v24, %v2289_v32  ;;  %v2875_v43 = vadd.f32 %v1163_v29, %v2416_v56  ;;  %v4006_v56 = vld [vmem:[#allocation38_spill] sm:$0xff] }
  0xf3   :  { %4000 = vst [vmem:[#allocation28_spill] sm:$0xff] %v2869_v20  ;;  %v1169_v10 = vmul.f32 %v622_v27, %v622_v27  ;;  %v1170_v45 = vmul.f32 %v623_v21, %v623_v21  ;;  %v627_v6 = vsub.f32 %v451_v24, %v3945_v58  ;;  %853 = vperm.xlu1 %1915, %v4001_v19   ;;  %v4005_v20 = vld [vmem:[#allocation18_spill] sm:$0xff]  ;;  %v4008_v27 = vld [vmem:[#allocation39_spill] sm:$0xff]  ;;  %v467_v19 = vpop.permute.xlu0 %466 }
  0xf4   :  { %v2880_v44 = vadd.f32 %v1164_v46, %v2418_v35  ;;  %v2883_v36 = vadd.f32 %v1165_v37, %v2422_v30  ;;  %v2886_v14 = vadd.f32 %v1166_v31, %v2408_v59  ;;  %v628_v13 = vsub.f32 %v455_v33, %v2287_v60  ;;  %865 = vperm.xlu0 %1916, %v4005_v20   ;;  %v463_v46 = vpop.permute.xlu1 %462  ;;  %v4010_v30 = vld [vmem:[#allocation43_spill] sm:$0xff] }
  0xf5   :  { %v2891_v29 = vadd.f32 %v1167_v55, %v4006_v56  ;;  %v2894_v24 = vadd.f32 %v1168_v62, %v4008_v27  ;;  %v1171_v21 = vmul.f32 %v624_v50, %v624_v50  ;;  %v629_v35 = vsub.f32 %v455_v33, %v2289_v32  ;;  %v1917_v50 = vld [vmem:[%s3826_s0 + $0x128] sm:$0xff] }
  0xf6   :  { %4002 = vst [vmem:[#allocation16_spill] sm:$0xff] %v2880_v44  ;;  %4003 = vst [vmem:[#allocation29_spill] sm:$0xff] %v2883_v36  ;;  %v2898_v37 = vadd.f32 %v1169_v10, %v4010_v30  ;;  %v1172_v59 = vmul.f32 %v625_v47, %v625_v47  ;;  %v1173_v31 = vmul.f32 %v626_v2, %v626_v2  ;;  %v4018_v36 = vld [vmem:[#allocation42_spill] sm:$0xff] }
  0xf7   :  { %4004 = vst [vmem:[#allocation30_spill] sm:$0xff] %v2886_v14  ;;  %4007 = vst [vmem:[#allocation36_spill] sm:$0xff] %v2891_v29  ;;  %v630_v14 = vsub.f32 %v455_v33, %v3945_v58  ;;  %v2902_v20 = vadd.f32 %v1170_v45, %v4012_v42  ;;  %v1174_v55 = vmul.f32 %v627_v6, %v627_v6  ;;  %861 = vperm.xlu1 %1915, %v1917_v50   ;;  %v4014_v33 = vld [vmem:[#allocation45_spill] sm:$0xff]  ;;  %v4015_v29 = vld [vmem:[#allocation40_spill] sm:$0xff] }
  0xf8   :  { %4009 = vst [vmem:[#allocation37_spill] sm:$0xff] %v2894_v24  ;;  %4011 = vst [vmem:[#allocation33_spill] sm:$0xff] %v2898_v37  ;;  %v1175_v56 = vmul.f32 %v628_v13, %v628_v13  ;;  %v631_v62 = vsub.f32 %v459_v11, %v2287_v60  ;;  %v1176_v27 = vmul.f32 %v629_v35, %v629_v35  ;;  %v471_v13 = vpop.permute.xlu1 %470  ;;  %v475_v24 = vpop.permute.xlu0 %474 }
  0xf9   :  { %4013 = vst [vmem:[#allocation13_spill] sm:$0xff] %v2902_v20  ;;  %v632_v10 = vsub.f32 %v459_v11, %v2289_v32  ;;  %v633_v47 = vsub.f32 %v459_v11, %v3945_v58  ;;  %v634_v2 = vsub.f32 %v463_v46, %v2287_v60  ;;  %v2912_v30 = vadd.f32 %v1171_v21, %v4014_v33  ;;  %v4023_v33 = vld [vmem:[#allocation47_spill] sm:$0xff] }
  0xfa   :  { %v1177_v42 = vmul.f32 %v630_v14, %v630_v14  ;;  %v1178_v45 = vmul.f32 %v631_v62, %v631_v62  ;;  %v635_v6 = vsub.f32 %v463_v46, %v2289_v32  ;;  %v2916_v20 = vadd.f32 %v1172_v59, %v4015_v29  ;;  %v1918_v29 = vld [vmem:[%s3826_s0 + $0x138] sm:$0xff]  ;;  %s1946_s0 = smov [#allocation2]  }
  0xfb   :  { %v1179_v50 = vmul.f32 %v632_v10, %v632_v10  ;;  %v1180_v35 = vmul.f32 %v633_v47, %v633_v47  ;;  %v636_v37 = vsub.f32 %v463_v46, %v3945_v58  ;;  %v2920_v11 = vadd.f32 %v1173_v31, %v4016_v17  ;;  %869 = vperm.xlu1 %1915, %v1918_v29   ;;  %v4021_v31 = vld [vmem:[#allocation46_spill] sm:$0xff]  ;;  %s1894_s12 = sshll.u32 %s1946_s0, 4  ;;  %s1895_s12 = int_to_ptr.vmem [resolvable:$true] %s1894_s12 }
  0xfc   :  { %v2923_v44 = vadd.f32 %v1174_v55, %v4018_v36  ;;  %v2926_v14 = vadd.f32 %v1175_v56, %v2478_v28  ;;  %v637_v21 = vsub.f32 %v467_v19, %v2287_v60  ;;  %v2933_v59 = vadd.f32 %v1176_v27, %v2480_v38  ;;  %v479_v10 = vpop.permute.xlu1 %478  ;;  %v483_v47 = vpop.permute.xlu0 %482  ;;  %v4025_v38 = vld [vmem:[#allocation48_spill] sm:$0xff]  ;;  %s1919_s13 = scalar_lea.vmem %s1895_s12, 3840  ;;  %p1924_p1 = scmp.lt.s32.totalorder %s1895_s12, %s1895_s12 }
  0xfd   :  { %4017 = vst [vmem:[#allocation34_spill] sm:$0xff] %v2920_v11  ;;  %v1181_v46 = vmul.f32 %v634_v2, %v634_v2  ;;  %v1182_v62 = vmul.f32 %v635_v6, %v635_v6  ;;  %v638_v17 = vsub.f32 %v467_v19, %v2289_v32  ;;  %v2937_v36 = vadd.f32 %v1177_v42, %v2482_v3  ;;  %p1920_p0 = scmp.ne.s32.totalorder %s1895_s12, %s1919_s13  ;;  %p1925_p2 = scmp.lt.s32.totalorder %s1919_s13, %s1919_s13 }
  0xfe   :  { %4019 = vst [vmem:[#allocation17_spill] sm:$0xff] %v2923_v44  ;;  %v2940_v28 = vadd.f32 %v1178_v45, %v4021_v31  ;;  %v1183_v55 = vmul.f32 %v636_v37, %v636_v37  ;;  %v639_v56 = vsub.f32 %v467_v19, %v3945_v58  ;;  %v2944_v29 = vadd.f32 %v1179_v50, %v4023_v33  ;;  %v4027_v31 = vld [vmem:[#allocation52_spill] sm:$0xff]  ;;  %v4029_v33 = vld [vmem:[#allocation53_spill] sm:$0xff] }
  0xff   :  { %4020 = vst [vmem:[#allocation35_spill] sm:$0xff] %v2937_v36  ;;  %v2947_v27 = vadd.f32 %v1180_v35, %v4025_v38  ;;  %v640_v2 = vsub.f32 %v471_v13, %v2287_v60  ;;  %v641_v6 = vsub.f32 %v471_v13, %v2289_v32  ;;  %v1184_v3 = vmul.f32 %v637_v21, %v637_v21  ;;  %p1926_p3 = por %p1925_p2, %p1924_p1 }
 0x100   :  { %4022 = vst [vmem:[#allocation15_spill] sm:$0xff] %v2940_v28  ;;  %4024 = vst [vmem:[#allocation18_spill] sm:$0xff] %v2944_v29  ;;  %v1185_v42 = vmul.f32 %v638_v17, %v638_v17  ;;  %v642_v45 = vsub.f32 %v471_v13, %v3945_v58  ;;  %v643_v37 = vsub.f32 %v475_v24, %v2287_v60  ;;  %v487_v17 = vpop.permute.xlu1 %486  ;;  %v491_v13 = vpop.permute.xlu0 %490 }
 0x101   :  { %4026 = vst [vmem:[#allocation38_spill] sm:$0xff] %v2947_v27  ;;  %v2954_v19 = vadd.f32 %v1181_v46, %v2494_v1  ;;  %v2957_v28 = vadd.f32 %v1182_v62, %v4027_v31  ;;  %v1186_v50 = vmul.f32 %v639_v56, %v639_v56  ;;  %v644_v35 = vsub.f32 %v475_v24, %v2289_v32  ;;  %v4031_v46 = vld [vmem:[#allocation49_spill] sm:$0xff]  ;;  %v4033_v56 = vld [vmem:[#allocation50_spill] sm:$0xff]  ;;  %p1927_p4 = pnand %p1926_p3, %p1920_p0 }
 0x102   :  { %v2961_v38 = vadd.f32 %v1183_v55, %v4029_v33  ;;  %v1187_v27 = vmul.f32 %v640_v2, %v640_v2  ;;  %v1188_v29 = vmul.f32 %v641_v6, %v641_v6  ;;  %v645_v21 = vsub.f32 %v475_v24, %v3945_v58  ;;  %v4035_v2 = vld [vmem:[#allocation51_spill] sm:$0xff] }
 0x103   :  { %4028 = vst [vmem:[#allocation39_spill] sm:$0xff] %v2957_v28  ;;  %v1189_v44 = vmul.f32 %v642_v45, %v642_v45  ;;  %v1190_v11 = vmul.f32 %v643_v37, %v643_v37  ;;  %v1191_v36 = vmul.f32 %v644_v35, %v644_v35  ;;  %v646_v1 = vsub.f32 %v479_v10, %v2287_v60  ;;  %v4037_v37 = vld [vmem:[#allocation57_spill] sm:$0xff] }
 0x104   :  { %4030 = vst [vmem:[#allocation43_spill] sm:$0xff] %v2961_v38  ;;  %v2966_v62 = vadd.f32 %v1184_v3, %v4031_v46  ;;  %v2969_v31 = vadd.f32 %v1185_v42, %v4033_v56  ;;  %v1192_v28 = vmul.f32 %v645_v21, %v645_v21  ;;  %v647_v55 = vsub.f32 %v479_v10, %v2289_v32  ;;  %v4038_v38 = vld [vmem:[#allocation58_spill] sm:$0xff]  ;;  %v495_v46 = vpop.permute.xlu1 %494  ;;  %v499_v56 = vpop.permute.xlu0 %498 }
 0x105   :  { %v2973_v6 = vadd.f32 %v1186_v50, %v4035_v2  ;;  %v648_v24 = vsub.f32 %v479_v10, %v3945_v58  ;;  %v1193_v33 = vmul.f32 %v646_v1, %v646_v1  ;;  %v649_v45 = vsub.f32 %v483_v47, %v2287_v60  ;;  %v4042_v2 = vld [vmem:[#allocation54_spill] sm:$0xff]  ;;  %v4044_v1 = vld [vmem:[#allocation55_spill] sm:$0xff] }
 0x106   :  { %4032 = vst [vmem:[#allocation44_spill] sm:$0xff] %v2966_v62  ;;  %4034 = vst [vmem:[#allocation45_spill] sm:$0xff] %v2969_v31  ;;  %v2978_v35 = vadd.f32 %v1187_v27, %v4037_v37  ;;  %v2981_v3 = vadd.f32 %v1188_v29, %v4038_v38  ;;  %v650_v42 = vsub.f32 %v483_v47, %v2289_v32  ;;  %v4040_v31 = vld [vmem:[#allocation59_spill] sm:$0xff]  ;;  %v4046_v37 = vld [vmem:[#allocation56_spill] sm:$0xff] }
 0x107   :  { %4036 = vst [vmem:[#allocation40_spill] sm:$0xff] %v2973_v6  ;;  %v651_v21 = vsub.f32 %v483_v47, %v3945_v58  ;;  %v2986_v50 = vadd.f32 %v1189_v44, %v4040_v31  ;;  %v2989_v10 = vadd.f32 %v1190_v11, %v4042_v2  ;;  %v2992_v6 = vadd.f32 %v1191_v36, %v4044_v1 }
 0x108   :  { %4039 = vst [vmem:[#allocation41_spill] sm:$0xff] %v2981_v3  ;;  %v652_v27 = vsub.f32 %v487_v17, %v2287_v60  ;;  %v2996_v29 = vadd.f32 %v1192_v28, %v4046_v37  ;;  %v1194_v38 = vmul.f32 %v647_v55, %v647_v55  ;;  %v1195_v62 = vmul.f32 %v648_v24, %v648_v24 }
 0x109   :  { %4041 = vst [vmem:[#allocation42_spill] sm:$0xff] %v2986_v50  ;;  %4043 = vst [vmem:[#allocation46_spill] sm:$0xff] %v2989_v10  ;;  %v653_v47 = vsub.f32 %v487_v17, %v2289_v32  ;;  %v3000_v3 = vadd.f32 %v1193_v33, %v2546_v7  ;;  %v1196_v44 = vmul.f32 %v649_v45, %v649_v45  ;;  %v507_v50 = vpop.permute.xlu0 %506 }
 0x10a   :  { %4045 = vst [vmem:[#allocation47_spill] sm:$0xff] %v2992_v6  ;;  %4047 = vst [vmem:[#allocation48_spill] sm:$0xff] %v2996_v29  ;;  %v654_v31 = vsub.f32 %v487_v17, %v3945_v58  ;;  %v1199_v11 = vmul.f32 %v652_v27, %v652_v27  ;;  %v1197_v2 = vmul.f32 %v650_v42, %v650_v42  ;;  %v503_v6 = vpop.permute.xlu1 %502  ;;  %v4052_v29 = vld [vmem:[#allocation61_spill] sm:$0xff] }
 0x10b   :  { %v1198_v10 = vmul.f32 %v651_v21, %v651_v21  ;;  %v1200_v36 = vmul.f32 %v653_v47, %v653_v47  ;;  %v655_v1 = vsub.f32 %v491_v13, %v2287_v60  ;;  %v656_v24 = vsub.f32 %v491_v13, %v2289_v32  ;;  %v4050_v47 = vld [vmem:[#allocation63_spill] sm:$0xff] }
 0x10c   :  { %v1201_v28 = vmul.f32 %v654_v31, %v654_v31  ;;  %v3005_v55 = vadd.f32 %v1199_v11, %v2564_v25  ;;  %v657_v7 = vsub.f32 %v491_v13, %v3945_v58  ;;  %v658_v45 = vsub.f32 %v495_v46, %v2287_v60 }
 0x10d   :  { %v3010_v33 = vadd.f32 %v1200_v36, %v2566_v23  ;;  %v1202_v17 = vmul.f32 %v655_v1, %v655_v1  ;;  %v659_v42 = vsub.f32 %v495_v46, %v2289_v32  ;;  %v3015_v21 = vadd.f32 %v1194_v38, %v2550_v39  ;;  %v515_v1 = vpop.permute.xlu0 %514  ;;  %v4053_v38 = vld [vmem:[#allocation62_spill] sm:$0xff] }
 0x10e   :  { %4048 = vst [vmem:[#allocation52_spill] sm:$0xff] %v3005_v55  ;;  %v3018_v27 = vadd.f32 %v1201_v28, %v2571_v48  ;;  %v1203_v25 = vmul.f32 %v656_v24, %v656_v24  ;;  %v660_v37 = vsub.f32 %v495_v46, %v3945_v58  ;;  %v3022_v31 = vadd.f32 %v1195_v62, %v4050_v47  ;;  %v511_v36 = vpop.permute.xlu1 %510  ;;  %v4054_v24 = vld [vmem:[#allocation64_spill] sm:$0xff] }
 0x10f   :  { %4049 = vst [vmem:[#allocation53_spill] sm:$0xff] %v3010_v33  ;;  %v1204_v13 = vmul.f32 %v657_v7, %v657_v7  ;;  %v1205_v23 = vmul.f32 %v658_v45, %v658_v45  ;;  %v1206_v11 = vmul.f32 %v659_v42, %v659_v42  ;;  %v4051_v33 = vld [vmem:[#allocation60_spill] sm:$0xff]  ;;  %v3028_v39 = vadd.f32 %v1197_v2, %v4052_v29 }
 0x110   :  { %v3025_v55 = vadd.f32 %v1196_v44, %v4051_v33  ;;  %v3031_v48 = vadd.f32 %v1198_v10, %v4053_v38  ;;  %v1207_v28 = vmul.f32 %v660_v37, %v660_v37  ;;  %v3034_v46 = vadd.f32 %v1202_v17, %v4054_v24  ;;  %v4055_v44 = vld [vmem:[#allocation65_spill] sm:$0xff]  ;;  %v4057_v17 = vld [vmem:[#allocation66_spill] sm:$0xff] }
 0x111   :  { %v3037_v62 = vadd.f32 %v1205_v23, %v2597_v4  ;;  %v3040_v7 = vadd.f32 %v1206_v11, %v2599_v41  ;;  %v661_v45 = vsub.f32 %v499_v56, %v2287_v60  ;;  %v3044_v33 = vadd.f32 %v1203_v25, %v4055_v44  ;;  %v523_v25 = vpop.permute.xlu0 %522 }
 0x112   :  { %v3047_v29 = vadd.f32 %v1207_v28, %v2601_v12  ;;  %v664_v10 = vsub.f32 %v503_v6, %v2287_v60  ;;  %v665_v2 = vsub.f32 %v503_v6, %v2289_v32  ;;  %v3052_v42 = vadd.f32 %v1204_v13, %v4057_v17  ;;  %v519_v47 = vpop.permute.xlu1 %518 }
 0x113   :  { %v3055_v4 = vsub.f32 %v499_v56, %v2289_v32  ;;  %v666_v41 = vsub.f32 %v503_v6, %v3945_v58  ;;  %v667_v37 = vsub.f32 %v507_v50, %v2287_v60  ;;  %v3060_v23 = vsub.f32 %v499_v56, %v3945_v58 }
 0x114   :  { %4056 = vst [vmem:[#allocation49_spill] sm:$0xff] %v3047_v29  ;;  %v1211_v12 = vmul.f32 %v664_v10, %v664_v10  ;;  %v1212_v11 = vmul.f32 %v665_v2, %v665_v2  ;;  %v668_v38 = vsub.f32 %v507_v50, %v2289_v32  ;;  %v3063_v28 = vmul.f32 %v661_v45, %v661_v45 }
 0x115   :  { %v1213_v13 = vmul.f32 %v666_v41, %v666_v41  ;;  %v669_v24 = vsub.f32 %v507_v50, %v3945_v58  ;;  %v1214_v44 = vmul.f32 %v667_v37, %v667_v37  ;;  %v670_v56 = vsub.f32 %v511_v36, %v2287_v60  ;;  %v531_v37 = vpop.permute.xlu0 %530 }
 0x116   :  { %v3067_v17 = vadd.f32 %v1211_v12, %v2614_v16  ;;  %v3070_v6 = vadd.f32 %v1212_v11, %v2619_v40  ;;  %v1215_v29 = vmul.f32 %v668_v38, %v668_v38  ;;  %v671_v41 = vsub.f32 %v511_v36, %v2289_v32  ;;  %v527_v50 = vpop.permute.xlu1 %526  ;;  %v4062_v38 = vld [vmem:[#allocation73_spill] sm:$0xff] }
 0x117   :  { %v3074_v10 = vadd.f32 %v1213_v13, %v2621_v51  ;;  %v1216_v2 = vmul.f32 %v669_v24, %v669_v24  ;;  %v3077_v45 = vadd.f32 %v1214_v44, %v2604_v5  ;;  %v672_v40 = vsub.f32 %v511_v36, %v3945_v58  ;;  %v4064_v44 = vld [vmem:[#allocation77_spill] sm:$0xff] }
 0x118   :  { %4058 = vst [vmem:[#allocation50_spill] sm:$0xff] %v3070_v6  ;;  %v3081_v16 = vadd.f32 %v1215_v29, %v2606_v34  ;;  %v1217_v12 = vmul.f32 %v670_v56, %v670_v56  ;;  %v673_v11 = vsub.f32 %v515_v1, %v2287_v60  ;;  %v1218_v51 = vmul.f32 %v671_v41, %v671_v41  ;;  %v4066_v29 = vld [vmem:[#allocation78_spill] sm:$0xff] }
 0x119   :  { %4059 = vst [vmem:[#allocation51_spill] sm:$0xff] %v3074_v10  ;;  %4060 = vst [vmem:[#allocation57_spill] sm:$0xff] %v3077_v45  ;;  %v3086_v6 = vadd.f32 %v1216_v2, %v4062_v38  ;;  %v674_v13 = vsub.f32 %v515_v1, %v2289_v32  ;;  %v675_v5 = vsub.f32 %v515_v1, %v3945_v58 }
 0x11a   :  { %4061 = vst [vmem:[#allocation58_spill] sm:$0xff] %v3081_v16  ;;  %v1219_v24 = vmul.f32 %v672_v40, %v672_v40  ;;  %v3091_v45 = vadd.f32 %v1217_v12, %v4064_v44  ;;  %v1220_v10 = vmul.f32 %v673_v11, %v673_v11  ;;  %v676_v34 = vsub.f32 %v519_v47, %v2287_v60  ;;  %v535_v38 = vpop.permute.xlu1 %534  ;;  %v539_v11 = vpop.permute.xlu0 %538  ;;  %v4069_v44 = vld [vmem:[#allocation75_spill] sm:$0xff] }
 0x11b   :  { %4063 = vst [vmem:[#allocation59_spill] sm:$0xff] %v3086_v6  ;;  %v3095_v36 = vadd.f32 %v1218_v51, %v4066_v29  ;;  %v1221_v56 = vmul.f32 %v674_v13, %v674_v13  ;;  %v1222_v16 = vmul.f32 %v675_v5, %v675_v5  ;;  %v677_v2 = vsub.f32 %v519_v47, %v2289_v32  ;;  %v4068_v6 = vld [vmem:[#allocation74_spill] sm:$0xff]  ;;  %v4071_v51 = vld [vmem:[#allocation76_spill] sm:$0xff] }
 0x11c   :  { %4065 = vst [vmem:[#allocation54_spill] sm:$0xff] %v3091_v45  ;;  %v3099_v41 = vadd.f32 %v1219_v24, %v2649_v9  ;;  %v3102_v1 = vadd.f32 %v1220_v10, %v4068_v6  ;;  %v678_v40 = vsub.f32 %v519_v47, %v3945_v58  ;;  %v1223_v12 = vmul.f32 %v676_v34, %v676_v34 }
 0x11d   :  { %4067 = vst [vmem:[#allocation55_spill] sm:$0xff] %v3095_v36  ;;  %v3106_v45 = vadd.f32 %v1221_v56, %v4069_v44  ;;  %v3109_v29 = vadd.f32 %v1222_v16, %v4071_v51  ;;  %v1224_v13 = vmul.f32 %v677_v2, %v677_v2  ;;  %v679_v5 = vsub.f32 %v523_v25, %v2287_v60 }
 0x11e   :  { %v1225_v36 = vmul.f32 %v678_v40, %v678_v40  ;;  %v3113_v9 = vadd.f32 %v1223_v12, %v2658_v57  ;;  %v680_v6 = vsub.f32 %v523_v25, %v2289_v32  ;;  %v681_v10 = vsub.f32 %v523_v25, %v3945_v58  ;;  %v543_v56 = vpop.permute.xlu1 %542 }
 0x11f   :  { %4070 = vst [vmem:[#allocation56_spill] sm:$0xff] %v3106_v45  ;;  %4072 = vst [vmem:[#allocation63_spill] sm:$0xff] %v3109_v29  ;;  %v3118_v47 = vadd.f32 %v1224_v13, %v2660_v8  ;;  %v1226_v24 = vmul.f32 %v679_v5, %v679_v5  ;;  %v682_v34 = vsub.f32 %v527_v50, %v2287_v60  ;;  %v4075_v13 = vld [vmem:[#allocation79_spill] sm:$0xff]  ;;  %v4077_v29 = vld [vmem:[#allocation80_spill] sm:$0xff] }
 0x120   :  { %v683_v16 = vsub.f32 %v527_v50, %v2289_v32  ;;  %v3123_v2 = vadd.f32 %v1225_v36, %v2662_v53  ;;  %v1227_v40 = vmul.f32 %v680_v6, %v680_v6  ;;  %v1228_v44 = vmul.f32 %v681_v10, %v681_v10  ;;  %v547_v36 = vpop.permute.xlu0 %546  ;;  %v4079_v6 = vld [vmem:[#allocation84_spill] sm:$0xff] }
 0x121   :  { %4073 = vst [vmem:[#allocation60_spill] sm:$0xff] %v3118_v47  ;;  %v684_v57 = vsub.f32 %v527_v50, %v3945_v58  ;;  %v3127_v12 = vadd.f32 %v1226_v24, %v2651_v18  ;;  %v1229_v25 = vmul.f32 %v682_v34, %v682_v34  ;;  %v685_v8 = vsub.f32 %v531_v37, %v2287_v60  ;;  %v4080_v50 = vld [vmem:[#allocation85_spill] sm:$0xff] }
 0x122   :  { %v1230_v51 = vmul.f32 %v683_v16, %v683_v16  ;;  %v3131_v5 = vadd.f32 %v1227_v40, %v4075_v13  ;;  %v3134_v45 = vadd.f32 %v1228_v44, %v4077_v29  ;;  %v686_v53 = vsub.f32 %v531_v37, %v2289_v32  ;;  %v4082_v16 = vld [vmem:[#allocation86_spill] sm:$0xff]  ;;  %v4084_v13 = vld [vmem:[#allocation81_spill] sm:$0xff] }
 0x123   :  { %4074 = vst [vmem:[#allocation61_spill] sm:$0xff] %v3127_v12  ;;  %v1231_v47 = vmul.f32 %v684_v57, %v684_v57  ;;  %v3138_v10 = vadd.f32 %v1229_v25, %v4079_v6  ;;  %v687_v24 = vsub.f32 %v531_v37, %v3945_v58  ;;  %v1232_v34 = vmul.f32 %v685_v8, %v685_v8  ;;  %v551_v6 = vpop.permute.xlu1 %550 }
 0x124   :  { %4076 = vst [vmem:[#allocation62_spill] sm:$0xff] %v3131_v5  ;;  %4078 = vst [vmem:[#allocation64_spill] sm:$0xff] %v3134_v45  ;;  %v3141_v18 = vadd.f32 %v1230_v51, %v4080_v50  ;;  %v1233_v40 = vmul.f32 %v686_v53, %v686_v53  ;;  %v688_v29 = vsub.f32 %v535_v38, %v2287_v60  ;;  %v4086_v50 = vld [vmem:[#allocation82_spill] sm:$0xff] }
 0x125   :  { %v3145_v12 = vadd.f32 %v1231_v47, %v4082_v16  ;;  %v689_v44 = vsub.f32 %v535_v38, %v2289_v32  ;;  %v1234_v57 = vmul.f32 %v687_v24, %v687_v24  ;;  %v3150_v45 = vadd.f32 %v1232_v34, %v4084_v13  ;;  %v4088_v16 = vld [vmem:[#allocation83_spill] sm:$0xff] }
 0x126   :  { %4081 = vst [vmem:[#allocation65_spill] sm:$0xff] %v3141_v18  ;;  %v690_v25 = vsub.f32 %v535_v38, %v3945_v58  ;;  %v691_v51 = vsub.f32 %v539_v11, %v2287_v60  ;;  %v3155_v37 = vadd.f32 %v1233_v40, %v4086_v50  ;;  %v1235_v8 = vmul.f32 %v688_v29, %v688_v29  ;;  %v4090_v38 = vld [vmem:[#allocation90_spill] sm:$0xff]  ;;  %v555_v29 = vpop.permute.xlu0 %554 }
 0x127   :  { %4083 = vst [vmem:[#allocation66_spill] sm:$0xff] %v3145_v12  ;;  %4085 = vst [vmem:[#allocation73_spill] sm:$0xff] %v3150_v45  ;;  %v1236_v47 = vmul.f32 %v689_v44, %v689_v44  ;;  %v692_v53 = vsub.f32 %v539_v11, %v2289_v32  ;;  %v3159_v12 = vadd.f32 %v1234_v57, %v4088_v16  ;;  %v4092_v44 = vld [vmem:[#allocation91_spill] sm:$0xff] }
 0x128   :  { %4087 = vst [vmem:[#allocation77_spill] sm:$0xff] %v3155_v37  ;;  %v1237_v5 = vmul.f32 %v690_v25, %v690_v25  ;;  %v693_v24 = vsub.f32 %v539_v11, %v3945_v58  ;;  %v1238_v34 = vmul.f32 %v691_v51, %v691_v51  ;;  %v3163_v13 = vadd.f32 %v1235_v8, %v2701_v54  ;;  %v4094_v57 = vld [vmem:[#allocation87_spill] sm:$0xff]  ;;  %v4096_v25 = vld [vmem:[#allocation88_spill] sm:$0xff] }
 0x129   :  { %4089 = vst [vmem:[#allocation78_spill] sm:$0xff] %v3159_v12  ;;  %v3166_v45 = vadd.f32 %v1236_v47, %v4090_v38  ;;  %v1239_v18 = vmul.f32 %v692_v53, %v692_v53  ;;  %v694_v40 = vsub.f32 %v543_v56, %v2287_v60  ;;  %v695_v11 = vsub.f32 %v543_v56, %v2289_v32  ;;  %v4098_v53 = vld [vmem:[#allocation89_spill] sm:$0xff] }
 0x12a   :  { %v3170_v50 = vadd.f32 %v1237_v5, %v4092_v44  ;;  %v1240_v37 = vmul.f32 %v693_v24, %v693_v24  ;;  %v3173_v16 = vadd.f32 %v1238_v34, %v4094_v57  ;;  %v696_v54 = vsub.f32 %v543_v56, %v3945_v58  ;;  %v559_v34 = vpop.permute.xlu1 %558  ;;  %v4100_v57 = vld [vmem:[#allocation95_spill] sm:$0xff]  ;;  %v4102_v56 = vld [vmem:[#allocation96_spill] sm:$0xff] }
 0x12b   :  { %4091 = vst [vmem:[#allocation74_spill] sm:$0xff] %v3166_v45  ;;  %v3177_v51 = vadd.f32 %v1239_v18, %v4096_v25  ;;  %v1241_v8 = vmul.f32 %v694_v40, %v694_v40  ;;  %v697_v47 = vsub.f32 %v547_v36, %v2287_v60  ;;  %v1242_v12 = vmul.f32 %v695_v11, %v695_v11  ;;  %v4104_v11 = vld [vmem:[#allocation97_spill] sm:$0xff]  ;;  %v4110_v45 = vld [vmem:[#allocation94_spill] sm:$0xff] }
 0x12c   :  { %4093 = vst [vmem:[#allocation75_spill] sm:$0xff] %v3170_v50  ;;  %4095 = vst [vmem:[#allocation76_spill] sm:$0xff] %v3173_v16  ;;  %v3182_v38 = vadd.f32 %v1240_v37, %v4098_v53  ;;  %v698_v5 = vsub.f32 %v547_v36, %v2289_v32  ;;  %v699_v24 = vsub.f32 %v547_v36, %v3945_v58 }
 0x12d   :  { %4097 = vst [vmem:[#allocation79_spill] sm:$0xff] %v3177_v51  ;;  %v1243_v44 = vmul.f32 %v696_v54, %v696_v54  ;;  %v3187_v16 = vadd.f32 %v1241_v8, %v4100_v57  ;;  %v1244_v18 = vmul.f32 %v697_v47, %v697_v47  ;;  %v700_v25 = vsub.f32 %v551_v6, %v2287_v60  ;;  %v563_v57 = vpop.permute.xlu0 %562  ;;  %v4108_v47 = vld [vmem:[#allocation93_spill] sm:$0xff] }
 0x12e   :  { %4099 = vst [vmem:[#allocation80_spill] sm:$0xff] %v3182_v38  ;;  %v3191_v40 = vadd.f32 %v1242_v12, %v4102_v56  ;;  %v1245_v51 = vmul.f32 %v698_v5, %v698_v5  ;;  %v1246_v50 = vmul.f32 %v699_v24, %v699_v24  ;;  %v701_v37 = vsub.f32 %v551_v6, %v2289_v32  ;;  %v4106_v38 = vld [vmem:[#allocation92_spill] sm:$0xff] }
 0x12f   :  { %4101 = vst [vmem:[#allocation84_spill] sm:$0xff] %v3187_v16  ;;  %v3195_v53 = vadd.f32 %v1243_v44, %v4104_v11  ;;  %v3198_v36 = vadd.f32 %v1244_v18, %v4106_v38  ;;  %v702_v54 = vsub.f32 %v551_v6, %v3945_v58  ;;  %v1247_v8 = vmul.f32 %v700_v25, %v700_v25 }
 0x130   :  { %4103 = vst [vmem:[#allocation85_spill] sm:$0xff] %v3191_v40  ;;  %v3202_v16 = vadd.f32 %v1245_v51, %v4108_v47  ;;  %v3205_v12 = vadd.f32 %v1246_v50, %v4110_v45  ;;  %v1248_v5 = vmul.f32 %v701_v37, %v701_v37  ;;  %v703_v24 = vsub.f32 %v555_v29, %v2287_v60  ;;  %v4112_v40 = vld [vmem:[#allocation21_spill] sm:$0xff]  ;;  %v714_v50 = vpop.permute.xlu1 %713 }
 0x131   :  { %4105 = vst [vmem:[#allocation86_spill] sm:$0xff] %v3195_v53  ;;  %4107 = vst [vmem:[#allocation81_spill] sm:$0xff] %v3198_v36  ;;  %v1249_v56 = vmul.f32 %v702_v54, %v702_v54  ;;  %v3209_v44 = vadd.f32 %v1247_v8, %v4112_v40  ;;  %v704_v38 = vsub.f32 %v555_v29, %v2289_v32  ;;  %v4115_v37 = vld [vmem:[#allocation5_spill] sm:$0xff]  ;;  %v4117_v8 = vld [vmem:[#allocation98_spill] sm:$0xff] }
 0x132   :  { %4109 = vst [vmem:[#allocation82_spill] sm:$0xff] %v3202_v16  ;;  %4111 = vst [vmem:[#allocation83_spill] sm:$0xff] %v3205_v12  ;;  %v705_v18 = vsub.f32 %v555_v29, %v3945_v58  ;;  %v3214_v6 = vadd.f32 %v1248_v5, %v2745_v61  ;;  %v1250_v25 = vmul.f32 %v703_v24, %v703_v24  ;;  %v4119_v5 = vld [vmem:[#allocation99_spill] sm:$0xff] }
 0x133   :  { %4113 = vst [vmem:[#allocation90_spill] sm:$0xff] %v3209_v44  ;;  %v706_v51 = vsub.f32 %v559_v34, %v2287_v60  ;;  %v707_v45 = vsub.f32 %v559_v34, %v2289_v32  ;;  %v3219_v11 = vadd.f32 %v1249_v56, %v4115_v37  ;;  %v1251_v54 = vmul.f32 %v704_v38, %v704_v38  ;;  %v718_v38 = vpop.permute.xlu0 %717 }
 0x134   :  { %4114 = vst [vmem:[#allocation91_spill] sm:$0xff] %v3214_v6  ;;  %v1252_v47 = vmul.f32 %v705_v18, %v705_v18  ;;  %v708_v40 = vsub.f32 %v559_v34, %v3945_v58  ;;  %v3223_v12 = vadd.f32 %v1250_v25, %v4117_v8  ;;  %v709_v61 = vsub.f32 %v563_v57, %v2287_v60  ;;  %v4121_v6 = vld [vmem:[#allocation100_spill] sm:$0xff]  ;;  %v4125_v60 = vld [vmem:[#allocation6_spill] sm:$0xff] }
 0x135   :  { %4116 = vst [vmem:[#allocation87_spill] sm:$0xff] %v3219_v11  ;;  %v1253_v29 = vmul.f32 %v706_v51, %v706_v51  ;;  %v1254_v16 = vmul.f32 %v707_v45, %v707_v45  ;;  %v3227_v24 = vadd.f32 %v1251_v54, %v4119_v5  ;;  %v710_v56 = vsub.f32 %v563_v57, %v2289_v32  ;;  %v4127_v54 = vld [vmem:[#allocation68_spill] sm:$0xff]  ;;  %v4129_v32 = vld [vmem:[#allocation101_spill] sm:$0xff]  ;;  %v4153_v11 = vld [vmem:[#allocation22_spill] sm:$0xff] }
 0x136   :  { %4118 = vst [vmem:[#allocation88_spill] sm:$0xff] %v3223_v12  ;;  %v3230_v36 = vadd.f32 %v1252_v47, %v4121_v6  ;;  %v1255_v44 = vmul.f32 %v708_v40, %v708_v40  ;;  %v711_v25 = vsub.f32 %v563_v57, %v3945_v58  ;;  %v1256_v51 = vmul.f32 %v709_v61, %v709_v61  ;;  %v4128_v47 = vld [vmem:[#allocation71_spill] sm:$0xff] }
 0x137   :  { %4120 = vst [vmem:[#allocation89_spill] sm:$0xff] %v3227_v24  ;;  %v3234_v18 = vadd.f32 %v1253_v29, %v2757_v22  ;;  %v3237_v34 = vadd.f32 %v1254_v16, %v2759_v52  ;;  %v1257_v37 = vmul.f32 %v710_v56, %v710_v56  ;;  %v899_v6 = vsub.f32 %v714_v50, %v4127_v54  ;;  %v4131_v22 = vld [vmem:[#allocation72_spill] sm:$0xff]  ;;  %v722_v16 = vpop.permute.xlu1 %721  ;;  %v4134_v56 = vld [vmem:[#allocation102_spill] sm:$0xff] }
 0x138   :  { %4122 = vst [vmem:[#allocation95_spill] sm:$0xff] %v3230_v36  ;;  %v3241_v45 = vadd.f32 %v1255_v44, %v4125_v60  ;;  %v900_v40 = vsub.f32 %v714_v50, %v4128_v47  ;;  %v1258_v8 = vmul.f32 %v711_v25, %v711_v25  ;;  %v3246_v5 = vadd.f32 %v1256_v51, %v4129_v32  ;;  %v4132_v36 = vld [vmem:[#allocation8_spill] sm:$0xff]  ;;  %v4136_v32 = vld [vmem:[#allocation23_spill] sm:$0xff] }
 0x139   :  { %4123 = vst [vmem:[#allocation96_spill] sm:$0xff] %v3234_v18  ;;  %4124 = vst [vmem:[#allocation97_spill] sm:$0xff] %v3237_v34  ;;  %v901_v29 = vsub.f32 %v714_v50, %v4131_v22  ;;  %v902_v52 = vsub.f32 %v718_v38, %v4127_v54  ;;  %v3251_v58 = vadd.f32 %v1257_v37, %v4132_v36  ;;  %v4137_v50 = vld [vmem:[#allocation24_spill] sm:$0xff]  ;;  %v730_v36 = vpop.permute.xlu0 %729  ;;  %v4138_v37 = vld [vmem:[#allocation7_spill] sm:$0xff] }
 0x13a   :  { %4126 = vst [vmem:[#allocation92_spill] sm:$0xff] %v3241_v45  ;;  %4130 = vst [vmem:[#allocation93_spill] sm:$0xff] %v3246_v5  ;;  %v1379_v57 = vmul.f32 %v899_v6, %v899_v6  ;;  %v1380_v44 = vmul.f32 %v900_v40, %v900_v40  ;;  %v903_v61 = vsub.f32 %v718_v38, %v4128_v47 }
 0x13b   :  { %4133 = vst [vmem:[#allocation94_spill] sm:$0xff] %v3251_v58  ;;  %v3255_v60 = vadd.f32 %v1258_v8, %v4134_v56  ;;  %v1381_v45 = vmul.f32 %v901_v29, %v901_v29  ;;  %v904_v25 = vsub.f32 %v718_v38, %v4131_v22  ;;  %v1382_v51 = vmul.f32 %v902_v52, %v902_v52  ;;  %v4139_v58 = vld [vmem:[#allocation10_spill] sm:$0xff]  ;;  %v4140_v29 = vld [vmem:[#allocation103_spill] sm:$0xff]  ;;  %v726_v56 = vpop.permute.xlu1 %725 }
 0x13c   :  { %v1499_v5 = vadd.f32 %v1379_v57, %v4136_v32  ;;  %v1500_v34 = vadd.f32 %v1380_v44, %v4137_v50  ;;  %v1383_v24 = vmul.f32 %v903_v61, %v903_v61  ;;  %v905_v12 = vsub.f32 %v722_v16, %v4127_v54  ;;  %v4141_v57 = vld [vmem:[#allocation104_spill] sm:$0xff] }
 0x13d   :  { %4135 = vst [vmem:[#allocation21_spill] sm:$0xff] %v3255_v60  ;;  %v1501_v6 = vadd.f32 %v1381_v45, %v4138_v37  ;;  %v1384_v40 = vmul.f32 %v904_v25, %v904_v25  ;;  %v1502_v18 = vadd.f32 %v1382_v51, %v4139_v58  ;;  %v906_v8 = vsub.f32 %v722_v16, %v4128_v47  ;;  %v4152_v60 = vld [vmem:[#allocation20_spill] sm:$0xff] }
 0x13e   :  { %vm1619_vm0 = vcmp.lt.f32.partialorder %v1499_v5, 0.561001  ;;  %vm1620_vm1 = vcmp.lt.f32.partialorder %v1500_v34, 0.561001  ;;  %v1503_v38 = vadd.f32 %v1383_v24, %v4140_v29  ;;  %v907_v52 = vsub.f32 %v722_v16, %v4131_v22  ;;  %v4146_v34 = vld [vmem:[#allocation19_spill] sm:$0xff] }
 0x13f   :  { %vm1621_vm2 = vcmp.lt.f32.partialorder %v1501_v6, 0.561001  ;;  %v1504_v44 = vadd.f32 %v1384_v40, %v4141_v57  ;;  %vm1622_vm3 = vcmp.lt.f32.partialorder %v1502_v18, 0.561001  ;;  %v1385_v61 = vmul.f32 %v905_v12, %v905_v12  ;;  %v4149_v6 = vld [vmem:[#allocation67_spill] sm:$0xff] }
 0x140   :  { %vm1623_vm4 = vcmp.lt.f32.partialorder %v1503_v38, 0.561001  ;;  %vm3267_vm5 = vmpackc.low %vm1622_vm3, %vm1619_vm0  ;;  %v1386_v58 = vmul.f32 %v906_v8, %v906_v8  ;;  %v1387_v25 = vmul.f32 %v907_v52, %v907_v52  ;;  %v911_v5 = vsub.f32 %v730_v36, %v4127_v54  ;;  %v738_v8 = vpop.permute.xlu0 %737 }
 0x141   :  { %vm1624_vm6 = vcmp.lt.f32.partialorder %v1504_v44, 0.561001  ;;  %vm3272_vm7 = vmpackc.low %vm1623_vm4, %vm1620_vm1  ;;  %v1505_v16 = vadd.f32 %v1385_v61, %v4146_v34  ;;  %v912_v18 = vsub.f32 %v730_v36, %v4128_v47  ;;  %v913_v12 = vsub.f32 %v730_v36, %v4131_v22  ;;  %v734_v34 = vpop.permute.xlu1 %733 }
 0x142   :  { %v3281_v51 = vmul.f32 %v3055_v4, %v3055_v4  ;;  %vm3284_vm8 = vmpackc.low %vm1624_vm6, %vm1621_vm2  ;;  %v1506_v50 = vadd.f32 %v1386_v58, %v2803_v15  ;;  %v1391_v37 = vmul.f32 %v911_v5, %v911_v5  ;;  %v908_v40 = vsub.f32 %v726_v56, %v4127_v54 }
 0x143   :  { %v1507_v29 = vadd.f32 %v1387_v25, %v2806_v63  ;;  %v1392_v38 = vmul.f32 %v912_v18, %v912_v18  ;;  %v1393_v52 = vmul.f32 %v913_v12, %v913_v12  ;;  %v909_v36 = vsub.f32 %v726_v56, %v4128_v47  ;;  %v4150_v18 = vld [vmem:[#allocation25_spill] sm:$0xff]  ;;  %v4151_v12 = vld [vmem:[#allocation12_spill] sm:$0xff] }
 0x144   :  { %v3294_v4 = vmul.f32 %v3060_v23, %v3060_v23  ;;  %v3298_v57 = vadd.f32 %v3063_v28, %v4149_v6  ;;  %vm1625_vm9 = vcmp.lt.f32.partialorder %v1505_v16, 0.561001  ;;  %v910_v15 = vsub.f32 %v726_v56, %v4131_v22 }
 0x145   :  { %vm1626_vm10 = vcmp.lt.f32.partialorder %v1506_v50, 0.561001  ;;  %v1511_v44 = vadd.f32 %v1391_v37, %v2821_v49  ;;  %v1388_v61 = vmul.f32 %v908_v40, %v908_v40  ;;  %v1389_v63 = vmul.f32 %v909_v36, %v909_v36 }
 0x146   :  { %v1512_v58 = vadd.f32 %v1392_v38, %v2825_v26  ;;  %v1390_v25 = vmul.f32 %v910_v15, %v910_v15  ;;  %v917_v5 = vsub.f32 %v738_v8, %v4127_v54  ;;  %v918_v23 = vsub.f32 %v738_v8, %v4128_v47  ;;  %v746_v26 = vpop.permute.xlu0 %745 }
 0x147   :  { %vm1627_vm11 = vcmp.lt.f32.partialorder %v1507_v29, 0.561001  ;;  %v1513_v28 = vadd.f32 %v1393_v52, %v4150_v18  ;;  %v1508_v6 = vadd.f32 %v1388_v61, %v4151_v12  ;;  %v1509_v56 = vadd.f32 %v1389_v63, %v4152_v60  ;;  %v742_v18 = vpop.permute.xlu1 %741 }
 0x148   :  { %v1510_v53 = vadd.f32 %v1390_v25, %v4153_v11  ;;  %v919_v49 = vsub.f32 %v738_v8, %v4131_v22  ;;  %v1397_v37 = vmul.f32 %v917_v5, %v917_v5  ;;  %v1398_v40 = vmul.f32 %v918_v23, %v918_v23  ;;  %v4155_v25 = vld [vmem:[#allocation14_spill] sm:$0xff]  ;;  %v4156_v23 = vld [vmem:[#allocation31_spill] sm:$0xff] }
 0x149   :  { %vm1628_vm12 = vcmp.lt.f32.partialorder %v1508_v6, 0.561001  ;;  %vm1629_vm13 = vcmp.lt.f32.partialorder %v1509_v56, 0.561001  ;;  %v914_v38 = vsub.f32 %v734_v34, %v4127_v54  ;;  %v915_v36 = vsub.f32 %v734_v34, %v4128_v47  ;;  %v4158_v6 = vld [vmem:[#allocation26_spill] sm:$0xff] }
 0x14a   :  { %vm1631_vm14 = vcmp.lt.f32.partialorder %v1511_v44, 0.561001  ;;  %vm1632_vm15 = vcmp.lt.f32.partialorder %v1512_v58, 0.561001  ;;  %vm1630_vm0 = vcmp.lt.f32.partialorder %v1510_v53, 0.561001  ;;  %vm1740_vm1 = vmpackc.low %vm1628_vm12, %vm1625_vm9  ;;  %v1399_v52 = vmul.f32 %v919_v49, %v919_v49  ;;  %v754_v29 = vpop.permute.xlu0 %753 }
 0x14b   :  { %vm1741_vm2 = vmpackc.even %vm1740_vm1, %vm3267_vm5  ;;  %v916_v11 = vsub.f32 %v734_v34, %v4131_v22  ;;  %v1394_v60 = vmul.f32 %v914_v38, %v914_v38  ;;  %v1395_v8 = vmul.f32 %v915_v36, %v915_v36  ;;  %v923_v15 = vsub.f32 %v746_v26, %v4127_v54  ;;  %v4157_v34 = vld [vmem:[#allocation9_spill] sm:$0xff]  ;;  %v4159_v38 = vld [vmem:[#allocation27_spill] sm:$0xff] }
 0x14c   :  { %vm1633_vm3 = vcmp.lt.f32.partialorder %v1513_v28, 0.561001  ;;  %vm1743_vm4 = vmpackc.low %vm1629_vm13, %vm1626_vm10  ;;  %v4154_v61 = vmov 0   ;;  %v1517_v5 = vadd.f32 %v1397_v37, %v4155_v25  ;;  %v3321_v16 = vadd.f32 %v1398_v40, %v4156_v23  ;;  %v4168_v28 = vld [vmem:[#allocation32_spill] sm:$0xff] }
 0x14d   :  { %v1829_v63 = vsel %vm1741_vm2, 16843009, %v4154_v61  ;;  %vm1744_vm5 = vmpackc.even %vm1743_vm4, %vm3272_vm7  ;;  %v1396_v45 = vmul.f32 %v916_v11, %v916_v11  ;;  %v1514_v12 = vadd.f32 %v1394_v60, %v4157_v34  ;;  %v1515_v56 = vadd.f32 %v1395_v8, %v4158_v6  ;;  %v4167_v34 = vld [vmem:[#allocation29_spill] sm:$0xff] }
 0x14e   :  { %1859 = vst [vmem:[#allocation2] sm:$0xff] %v1829_v63  ;;  %v924_v50 = vsub.f32 %v746_v26, %v4128_v47  ;;  %vm1746_vm6 = vmpackc.low %vm1630_vm0, %vm1627_vm11  ;;  %v1830_v49 = vsel %vm1744_vm5, 16843009, %v4154_v61  ;;  %v3332_v37 = vadd.f32 %v1399_v52, %v2855_v0  ;;  %v925_v40 = vsub.f32 %v746_v26, %v4131_v22  ;;  %v4166_v63 = vld [vmem:[#allocation16_spill] sm:$0xff] }
 0x14f   :  { %v1403_v24 = vmul.f32 %v923_v15, %v923_v15  ;;  %vm1747_vm7 = vmpackc.even %vm1746_vm6, %vm3284_vm8  ;;  %1860 = vst [vmem:[#allocation2 + $0x8] sm:$0xff] %v1830_v49  ;;  %v1516_v36 = vadd.f32 %v1396_v45, %v4159_v38  ;;  %vm1634_vm9 = vcmp.lt.f32.partialorder %v1514_v12, 0.561001  ;;  %vm1635_vm10 = vcmp.lt.f32.partialorder %v1515_v56, 0.561001  ;;  %v750_v45 = vpop.permute.xlu1 %749  ;;  %v4170_v38 = vld [vmem:[#allocation28_spill] sm:$0xff] }
 0x150   :  { %v1404_v11 = vmul.f32 %v924_v50, %v924_v50  ;;  %v1831_v53 = vsel %vm1747_vm7, 16843009, %v4154_v61  ;;  %vm1637_vm11 = vcmp.lt.f32.partialorder %v1517_v5, 0.561001  ;;  %vm3340_vm12 = vmpackc.low %vm1634_vm9, %vm1631_vm14  ;;  %v1405_v26 = vmul.f32 %v925_v40, %v925_v40 }
 0x151   :  { %v920_v52 = vsub.f32 %v742_v18, %v4127_v54  ;;  %1861 = vst [vmem:[#allocation2 + $0x10] sm:$0xff] %v1831_v53  ;;  %vm1638_vm8 = vcmp.lt.f32.partialorder %v3321_v16, 0.561001  ;;  %vm1636_vm13 = vcmp.lt.f32.partialorder %v1516_v36, 0.561001  ;;  %vm3347_vm0 = vmpackc.low %vm1635_vm10, %vm1632_vm15  ;;  %v921_v60 = vsub.f32 %v742_v18, %v4128_v47  ;;  %v4174_v16 = vld [vmem:[#allocation36_spill] sm:$0xff] }
 0x152   :  { %v922_v44 = vsub.f32 %v742_v18, %v4131_v22  ;;  %vm3354_vm14 = vmpackc.low %vm1636_vm13, %vm1633_vm3  ;;  %v1523_v15 = vadd.f32 %v1403_v24, %v2875_v43  ;;  %v1524_v25 = vadd.f32 %v1404_v11, %v4166_v63  ;;  %v929_v58 = vsub.f32 %v754_v29, %v4127_v54  ;;  %v4169_v43 = vld [vmem:[#allocation11_spill] sm:$0xff] }
 0x153   :  { %v1400_v23 = vmul.f32 %v920_v52, %v920_v52  ;;  %v1525_v12 = vadd.f32 %v1405_v26, %v4167_v34  ;;  %v1401_v6 = vmul.f32 %v921_v60, %v921_v60  ;;  %v930_v50 = vsub.f32 %v754_v29, %v4128_v47  ;;  %v762_v60 = vpop.permute.xlu0 %761 }
 0x154   :  { %v1402_v56 = vmul.f32 %v922_v44, %v922_v44  ;;  %vm1639_vm15 = vcmp.lt.f32.partialorder %v3332_v37, 0.561001  ;;  %v931_v49 = vsub.f32 %v754_v29, %v4131_v22  ;;  %v1409_v40 = vmul.f32 %v929_v58, %v929_v58  ;;  %v4171_v44 = vld [vmem:[#allocation33_spill] sm:$0xff] }
 0x155   :  { %v1520_v18 = vadd.f32 %v1400_v23, %v4168_v28  ;;  %v1521_v24 = vadd.f32 %v1401_v6, %v4169_v43  ;;  %v1410_v11 = vmul.f32 %v930_v50, %v930_v50  ;;  %v926_v53 = vsub.f32 %v750_v45, %v4127_v54  ;;  %v4172_v6 = vld [vmem:[#allocation13_spill] sm:$0xff]  ;;  %v4173_v28 = vld [vmem:[#allocation30_spill] sm:$0xff] }
 0x156   :  { %v1522_v36 = vadd.f32 %v1402_v56, %v4170_v38  ;;  %vm1643_vm1 = vcmp.lt.f32.partialorder %v1523_v15, 0.561001  ;;  %v1411_v26 = vmul.f32 %v931_v49, %v931_v49  ;;  %v927_v52 = vsub.f32 %v750_v45, %v4128_v47 }
 0x157   :  { %vm1640_vm2 = vcmp.lt.f32.partialorder %v1520_v18, 0.561001  ;;  %vm1644_vm3 = vcmp.lt.f32.partialorder %v1524_v25, 0.561001  ;;  %vm1645_vm4 = vcmp.lt.f32.partialorder %v1525_v12, 0.561001  ;;  %v928_v29 = vsub.f32 %v750_v45, %v4131_v22  ;;  %v758_v45 = vpop.permute.xlu1 %757 }
 0x158   :  { %vm1641_vm5 = vcmp.lt.f32.partialorder %v1521_v24, 0.561001  ;;  %vm1749_vm6 = vmpackc.low %vm1640_vm2, %vm1637_vm11  ;;  %vm1642_vm7 = vcmp.lt.f32.partialorder %v1522_v36, 0.561001  ;;  %v1529_v63 = vadd.f32 %v1409_v40, %v4171_v44  ;;  %v1406_v23 = vmul.f32 %v926_v53, %v926_v53  ;;  %v4175_v24 = vld [vmem:[#allocation37_spill] sm:$0xff]  ;;  %v4182_v12 = vld [vmem:[#allocation35_spill] sm:$0xff] }
 0x159   :  { %vm1750_vm9 = vmpackc.even %vm1749_vm6, %vm3340_vm12  ;;  %v1407_v58 = vmul.f32 %v927_v52, %v927_v52  ;;  %v3379_v56 = vadd.f32 %v1410_v11, %v4172_v6  ;;  %v1408_v5 = vmul.f32 %v928_v29, %v928_v29  ;;  %v935_v50 = vsub.f32 %v762_v60, %v4127_v54 }
 0x15a   :  { %vm1752_vm10 = vmpackc.low %vm1641_vm5, %vm1638_vm8  ;;  %v1832_v34 = vsel %vm1750_vm9, 16843009, %v4154_v61  ;;  %v3385_v0 = vadd.f32 %v1411_v26, %v2912_v30  ;;  %v1526_v18 = vadd.f32 %v1406_v23, %v4173_v28  ;;  %v936_v40 = vsub.f32 %v762_v60, %v4128_v47  ;;  %v770_v26 = vpop.permute.xlu0 %769 }
 0x15b   :  { %vm1753_vm11 = vmpackc.even %vm1752_vm10, %vm3347_vm0  ;;  %1862 = vst [vmem:[#allocation2 + $0x18] sm:$0xff] %v1832_v34  ;;  %v1527_v49 = vadd.f32 %v1407_v58, %v4174_v16  ;;  %v1528_v38 = vadd.f32 %v1408_v5, %v4175_v24  ;;  %v937_v32 = vsub.f32 %v762_v60, %v4131_v22  ;;  %v1415_v11 = vmul.f32 %v935_v50, %v935_v50  ;;  %v766_v6 = vpop.permute.xlu1 %765 }
 0x15c   :  { %vm1755_vm12 = vmpackc.low %vm1642_vm7, %vm1639_vm15  ;;  %v1833_v43 = vsel %vm1753_vm11, 16843009, %v4154_v61  ;;  %vm1646_vm13 = vcmp.lt.f32.partialorder %v1526_v18, 0.561001  ;;  %v1416_v30 = vmul.f32 %v936_v40, %v936_v40  ;;  %v932_v53 = vsub.f32 %v758_v45, %v4127_v54 }
 0x15d   :  { %vm1756_vm8 = vmpackc.even %vm1755_vm12, %vm3354_vm14  ;;  %1863 = vst [vmem:[#allocation2 + $0x20] sm:$0xff] %v1833_v43  ;;  %vm1647_vm0 = vcmp.lt.f32.partialorder %v1527_v49, 0.561001  ;;  %vm1649_vm15 = vcmp.lt.f32.partialorder %v1529_v63, 0.561001  ;;  %v1417_v52 = vmul.f32 %v937_v32, %v937_v32  ;;  %v933_v60 = vsub.f32 %v758_v45, %v4128_v47 }
 0x15e   :  { %v1834_v37 = vsel %vm1756_vm8, 16843009, %v4154_v61  ;;  %vm1648_vm2 = vcmp.lt.f32.partialorder %v1528_v38, 0.561001  ;;  %vm3401_vm5 = vmpackc.low %vm1646_vm13, %vm1643_vm1  ;;  %vm1650_vm14 = vcmp.lt.f32.partialorder %v3379_v56, 0.561001  ;;  %v934_v29 = vsub.f32 %v758_v45, %v4131_v22  ;;  %v778_v32 = vpop.permute.xlu0 %777 }
 0x15f   :  { %1864 = vst [vmem:[#allocation2 + $0x28] sm:$0xff] %v1834_v37  ;;  %vm3407_vm6 = vmpackc.low %vm1647_vm0, %vm1644_vm3  ;;  %v1412_v44 = vmul.f32 %v932_v53, %v932_v53  ;;  %v1535_v23 = vadd.f32 %v1415_v11, %v2926_v14  ;;  %v1536_v58 = vadd.f32 %v1416_v30, %v2933_v59  ;;  %v941_v25 = vsub.f32 %v770_v26, %v4127_v54  ;;  %v4183_v14 = vld [vmem:[#allocation34_spill] sm:$0xff]  ;;  %v4184_v59 = vld [vmem:[#allocation17_spill] sm:$0xff] }
 0x160   :  { %vm3414_vm7 = vmpackc.low %vm1648_vm2, %vm1645_vm4  ;;  %v942_v34 = vsub.f32 %v770_v26, %v4128_v47  ;;  %vm1651_vm1 = vcmp.lt.f32.partialorder %v3385_v0, 0.561001  ;;  %v1413_v5 = vmul.f32 %v933_v60, %v933_v60  ;;  %v1414_v50 = vmul.f32 %v934_v29, %v934_v29  ;;  %v4186_v60 = vld [vmem:[#allocation15_spill] sm:$0xff] }
 0x161   :  { %v1532_v45 = vadd.f32 %v1412_v44, %v2916_v20  ;;  %v1537_v28 = vadd.f32 %v1417_v52, %v4182_v12  ;;  %v943_v18 = vsub.f32 %v770_v26, %v4131_v22  ;;  %v1421_v16 = vmul.f32 %v941_v25, %v941_v25  ;;  %v4185_v26 = vld [vmem:[#allocation39_spill] sm:$0xff]  ;;  %v774_v25 = vpop.permute.xlu1 %773 }
 0x162   :  { %v1422_v49 = vmul.f32 %v942_v34, %v942_v34  ;;  %v1533_v40 = vadd.f32 %v1413_v5, %v4183_v14  ;;  %v1534_v43 = vadd.f32 %v1414_v50, %v4184_v59  ;;  %v938_v24 = vsub.f32 %v766_v6, %v4127_v54  ;;  %v4187_v56 = vld [vmem:[#allocation43_spill] sm:$0xff]  ;;  %v4188_v5 = vld [vmem:[#allocation18_spill] sm:$0xff]  ;;  %v786_v15 = vpop.permute.xlu0 %785 }
 0x163   :  { %vm1652_vm3 = vcmp.lt.f32.partialorder %v1532_v45, 0.561001  ;;  %vm1655_vm4 = vcmp.lt.f32.partialorder %v1535_v23, 0.561001  ;;  %vm1656_vm9 = vcmp.lt.f32.partialorder %v1536_v58, 0.561001  ;;  %v1423_v38 = vmul.f32 %v943_v18, %v943_v18 }
 0x164   :  { %vm1758_vm10 = vmpackc.low %vm1652_vm3, %vm1649_vm15  ;;  %v939_v20 = vsub.f32 %v766_v6, %v4128_v47  ;;  %vm1653_vm11 = vcmp.lt.f32.partialorder %v1533_v40, 0.561001  ;;  %vm1654_vm12 = vcmp.lt.f32.partialorder %v1534_v43, 0.561001  ;;  %v940_v11 = vsub.f32 %v766_v6, %v4131_v22  ;;  %v4189_v45 = vld [vmem:[#allocation38_spill] sm:$0xff] }
 0x165   :  { %vm1759_vm8 = vmpackc.even %vm1758_vm10, %vm3401_vm5  ;;  %v1418_v30 = vmul.f32 %v938_v24, %v938_v24  ;;  %vm1657_vm13 = vcmp.lt.f32.partialorder %v1537_v28, 0.561001  ;;  %v1541_v63 = vadd.f32 %v1421_v16, %v2954_v19  ;;  %v3439_v37 = vadd.f32 %v1422_v49, %v4185_v26  ;;  %v782_v26 = vpop.permute.xlu1 %781  ;;  %v4199_v28 = vld [vmem:[#allocation45_spill] sm:$0xff] }
 0x166   :  { %vm1761_vm0 = vmpackc.low %vm1653_vm11, %vm1650_vm14  ;;  %v1835_v53 = vsel %vm1759_vm8, 16843009, %v4154_v61  ;;  %v1419_v36 = vmul.f32 %v939_v20, %v939_v20  ;;  %v1420_v52 = vmul.f32 %v940_v11, %v940_v11  ;;  %v947_v44 = vsub.f32 %v778_v32, %v4127_v54 }
 0x167   :  { %vm1762_vm15 = vmpackc.even %vm1761_vm0, %vm3407_vm6  ;;  %1865 = vst [vmem:[#allocation2 + $0x30] sm:$0xff] %v1835_v53  ;;  %v1538_v29 = vadd.f32 %v1418_v30, %v4186_v60  ;;  %v3450_v34 = vadd.f32 %v1423_v38, %v4187_v56  ;;  %v948_v8 = vsub.f32 %v778_v32, %v4128_v47  ;;  %v949_v6 = vsub.f32 %v778_v32, %v4131_v22  ;;  %v4196_v32 = vld [vmem:[#allocation41_spill] sm:$0xff]  ;;  %v4198_v60 = vld [vmem:[#allocation44_spill] sm:$0xff] }
 0x168   :  { %vm1764_vm2 = vmpackc.low %vm1654_vm12, %vm1651_vm1  ;;  %v1836_v19 = vsel %vm1762_vm15, 16843009, %v4154_v61  ;;  %v1539_v50 = vadd.f32 %v1419_v36, %v4188_v5  ;;  %v1540_v12 = vadd.f32 %v1420_v52, %v4189_v45  ;;  %v1427_v0 = vmul.f32 %v947_v44, %v947_v44  ;;  %v4197_v36 = vld [vmem:[#allocation42_spill] sm:$0xff]  ;;  %v794_v45 = vpop.permute.xlu0 %793 }
 0x169   :  { %vm1765_vm5 = vmpackc.even %vm1764_vm2, %vm3414_vm7  ;;  %1866 = vst [vmem:[#allocation2 + $0x38] sm:$0xff] %v1836_v19  ;;  %vm1658_vm14 = vcmp.lt.f32.partialorder %v1538_v29, 0.561001  ;;  %v1428_v49 = vmul.f32 %v948_v8, %v948_v8  ;;  %v1429_v14 = vmul.f32 %v949_v6, %v949_v6  ;;  %v944_v40 = vsub.f32 %v774_v25, %v4127_v54  ;;  %v4200_v8 = vld [vmem:[#allocation40_spill] sm:$0xff] }
 0x16a   :  { %v1837_v18 = vsel %vm1765_vm5, 16843009, %v4154_v61  ;;  %vm3460_vm6 = vmpackc.low %vm1658_vm14, %vm1655_vm4  ;;  %vm1661_vm7 = vcmp.lt.f32.partialorder %v1541_v63, 0.561001  ;;  %vm1659_vm1 = vcmp.lt.f32.partialorder %v1539_v50, 0.561001  ;;  %v945_v59 = vsub.f32 %v774_v25, %v4128_v47 }
 0x16b   :  { %1867 = vst [vmem:[#allocation2 + $0x40] sm:$0xff] %v1837_v18  ;;  %vm1660_vm3 = vcmp.lt.f32.partialorder %v1540_v12, 0.561001  ;;  %vm1662_vm10 = vcmp.lt.f32.partialorder %v3439_v37, 0.561001  ;;  %vm3468_vm11 = vmpackc.low %vm1659_vm1, %vm1656_vm9  ;;  %v1547_v43 = vadd.f32 %v1427_v0, %v2978_v35  ;;  %v946_v24 = vsub.f32 %v774_v25, %v4131_v22  ;;  %v790_v37 = vpop.permute.xlu1 %789 }
 0x16c   :  { %v1424_v38 = vmul.f32 %v944_v40, %v944_v40  ;;  %vm3475_vm4 = vmpackc.low %vm1660_vm3, %vm1657_vm13  ;;  %v1548_v11 = vadd.f32 %v1428_v49, %v4196_v32  ;;  %v1425_v30 = vmul.f32 %v945_v59, %v945_v59  ;;  %v953_v53 = vsub.f32 %v786_v15, %v4127_v54 }
 0x16d   :  { %v954_v58 = vsub.f32 %v786_v15, %v4128_v47  ;;  %vm1663_vm9 = vcmp.lt.f32.partialorder %v3450_v34, 0.561001  ;;  %v1549_v35 = vadd.f32 %v1429_v14, %v4197_v36  ;;  %v1426_v52 = vmul.f32 %v946_v24, %v946_v24  ;;  %v4202_v24 = vld [vmem:[#allocation47_spill] sm:$0xff] }
 0x16e   :  { %v1544_v29 = vadd.f32 %v1424_v38, %v4198_v60  ;;  %v1545_v44 = vadd.f32 %v1425_v30, %v4199_v28  ;;  %v955_v25 = vsub.f32 %v786_v15, %v4131_v22  ;;  %v1433_v19 = vmul.f32 %v953_v53, %v953_v53  ;;  %v4201_v15 = vld [vmem:[#allocation46_spill] sm:$0xff]  ;;  %v4203_v53 = vld [vmem:[#allocation48_spill] sm:$0xff] }
 0x16f   :  { %v1434_v56 = vmul.f32 %v954_v58, %v954_v58  ;;  %v1546_v6 = vadd.f32 %v1426_v52, %v4200_v8  ;;  %v950_v5 = vsub.f32 %v782_v26, %v4127_v54  ;;  %v951_v50 = vsub.f32 %v782_v26, %v4128_v47  ;;  %v4208_v28 = vld [vmem:[#allocation52_spill] sm:$0xff] }
 0x170   :  { %vm1664_vm12 = vcmp.lt.f32.partialorder %v1544_v29, 0.561001  ;;  %vm1667_vm8 = vcmp.lt.f32.partialorder %v1547_v43, 0.561001  ;;  %vm1668_vm13 = vcmp.lt.f32.partialorder %v1548_v11, 0.561001  ;;  %v1435_v12 = vmul.f32 %v955_v25, %v955_v25 }
 0x171   :  { %vm1665_vm0 = vcmp.lt.f32.partialorder %v1545_v44, 0.561001  ;;  %vm1767_vm15 = vmpackc.low %vm1664_vm12, %vm1661_vm7  ;;  %vm1666_vm2 = vcmp.lt.f32.partialorder %v1546_v6, 0.561001  ;;  %v952_v0 = vsub.f32 %v782_v26, %v4131_v22  ;;  %v1430_v18 = vmul.f32 %v950_v5, %v950_v5  ;;  %v802_v26 = vpop.permute.xlu0 %801 }
 0x172   :  { %vm1768_vm5 = vmpackc.even %vm1767_vm15, %vm3460_vm6  ;;  %v1431_v49 = vmul.f32 %v951_v50, %v951_v50  ;;  %vm1669_vm14 = vcmp.lt.f32.partialorder %v1549_v35, 0.561001  ;;  %v1553_v40 = vadd.f32 %v1433_v19, %v3000_v3  ;;  %v3499_v63 = vadd.f32 %v1434_v56, %v3015_v21  ;;  %v4211_v56 = vld [vmem:[#allocation53_spill] sm:$0xff]  ;;  %v4218_v19 = vld [vmem:[#allocation70_spill] sm:$0xff] }
 0x173   :  { %vm1770_vm1 = vmpackc.low %vm1665_vm0, %vm1662_vm10  ;;  %v1838_v14 = vsel %vm1768_vm5, 16843009, %v4154_v61  ;;  %v1432_v16 = vmul.f32 %v952_v0, %v952_v0  ;;  %v1550_v59 = vadd.f32 %v1430_v18, %v4201_v15  ;;  %v959_v32 = vsub.f32 %v794_v45, %v4127_v54  ;;  %v798_v0 = vpop.permute.xlu1 %797 }
 0x174   :  { %vm1771_vm7 = vmpackc.even %vm1770_vm1, %vm3468_vm11  ;;  %1868 = vst [vmem:[#allocation2 + $0x48] sm:$0xff] %v1838_v14  ;;  %v1551_v38 = vadd.f32 %v1431_v49, %v4202_v24  ;;  %v3511_v21 = vadd.f32 %v1435_v12, %v3022_v31  ;;  %v960_v23 = vsub.f32 %v794_v45, %v4128_v47  ;;  %v961_v30 = vsub.f32 %v794_v45, %v4131_v22  ;;  %v4213_v31 = vld [vmem:[#allocation49_spill] sm:$0xff] }
 0x175   :  { %vm1773_vm6 = vmpackc.low %vm1666_vm2, %vm1663_vm9  ;;  %v1839_v3 = vsel %vm1771_vm7, 16843009, %v4154_v61  ;;  %v1552_v58 = vadd.f32 %v1432_v16, %v4203_v53  ;;  %vm1670_vm10 = vcmp.lt.f32.partialorder %v1550_v59, 0.561001  ;;  %v1439_v34 = vmul.f32 %v959_v32, %v959_v32  ;;  %v810_v24 = vpop.permute.xlu0 %809 }
 0x176   :  { %vm1774_vm3 = vmpackc.even %vm1773_vm6, %vm3475_vm4  ;;  %1869 = vst [vmem:[#allocation2 + $0x50] sm:$0xff] %v1839_v3  ;;  %vm1671_vm11 = vcmp.lt.f32.partialorder %v1551_v38, 0.561001  ;;  %v1440_v52 = vmul.f32 %v960_v23, %v960_v23  ;;  %v1441_v60 = vmul.f32 %v961_v30, %v961_v30  ;;  %v956_v29 = vsub.f32 %v790_v37, %v4127_v54  ;;  %v4212_v38 = vld [vmem:[#allocation69_spill] sm:$0xff] }
 0x177   :  { %v1840_v36 = vsel %vm1774_vm3, 16843009, %v4154_v61  ;;  %vm3520_vm9 = vmpackc.low %vm1670_vm10, %vm1667_vm8  ;;  %vm1672_vm4 = vcmp.lt.f32.partialorder %v1552_v58, 0.561001  ;;  %v1559_v44 = vadd.f32 %v1439_v34, %v4208_v28  ;;  %v957_v25 = vsub.f32 %v790_v37, %v4128_v47 }
 0x178   :  { %1870 = vst [vmem:[#allocation2 + $0x58] sm:$0xff] %v1840_v36  ;;  %vm3526_vm12 = vmpackc.low %vm1671_vm11, %vm1668_vm13  ;;  %v958_v43 = vsub.f32 %v790_v37, %v4131_v22  ;;  %vm1673_vm8 = vcmp.lt.f32.partialorder %v1553_v40, 0.561001  ;;  %v1560_v8 = vadd.f32 %v1440_v52, %v4211_v56  ;;  %v1436_v6 = vmul.f32 %v956_v29, %v956_v29  ;;  %v806_v40 = vpop.permute.xlu1 %805 }
 0x179   :  { %vm3534_vm0 = vmpackc.low %vm1672_vm4, %vm1669_vm14  ;;  %v965_v11 = vsub.f32 %v802_v26, %v4127_v54  ;;  %v3541_v5 = vadd.f32 %v1441_v60, %v3018_v27  ;;  %v1437_v50 = vmul.f32 %v957_v25, %v957_v25  ;;  %v966_v12 = vsub.f32 %v802_v26, %v4128_v47 }
 0x17a   :  { %v1438_v45 = vmul.f32 %v958_v43, %v958_v43  ;;  %vm1674_vm13 = vcmp.lt.f32.partialorder %v3499_v63, 0.561001  ;;  %vm1675_vm15 = vcmp.lt.f32.partialorder %v3511_v21, 0.561001  ;;  %vm1679_vm2 = vcmp.lt.f32.partialorder %v1559_v44, 0.561001 }
 0x17b   :  { %v1556_v35 = vadd.f32 %v1436_v6, %v3025_v55  ;;  %v1557_v18 = vadd.f32 %v1437_v50, %v3028_v39  ;;  %v967_v14 = vsub.f32 %v802_v26, %v4131_v22  ;;  %v1445_v27 = vmul.f32 %v965_v11, %v965_v11  ;;  %v4221_v50 = vld [vmem:[#allocation50_spill] sm:$0xff] }
 0x17c   :  { %v1558_v49 = vadd.f32 %v1438_v45, %v3031_v48  ;;  %v1446_v16 = vmul.f32 %v966_v12, %v966_v12  ;;  %v962_v15 = vsub.f32 %v798_v0, %v4127_v54  ;;  %v963_v59 = vsub.f32 %v798_v0, %v4128_v47  ;;  %v814_v11 = vpop.permute.xlu1 %813 }
 0x17d   :  { %vm1676_vm5 = vcmp.lt.f32.partialorder %v1556_v35, 0.561001  ;;  %v1329_v32 = vadd.f32 %v3281_v51, %v4212_v38  ;;  %vm1680_vm14 = vcmp.lt.f32.partialorder %v1560_v8, 0.561001  ;;  %vm1681_vm1 = vcmp.lt.f32.partialorder %v3541_v5, 0.561001 }
 0x17e   :  { %vm1677_vm7 = vcmp.lt.f32.partialorder %v1557_v18, 0.561001  ;;  %vm1776_vm6 = vmpackc.low %vm1676_vm5, %vm1673_vm8  ;;  %vm1678_vm3 = vcmp.lt.f32.partialorder %v1558_v49, 0.561001  ;;  %v964_v55 = vsub.f32 %v798_v0, %v4131_v22  ;;  %v1442_v39 = vmul.f32 %v962_v15, %v962_v15 }
 0x17f   :  { %vm1777_vm10 = vmpackc.even %vm1776_vm6, %vm3520_vm9  ;;  %v1443_v48 = vmul.f32 %v963_v59, %v963_v59  ;;  %v1447_v51 = vmul.f32 %v967_v14, %v967_v14  ;;  %v1565_v3 = vadd.f32 %v1445_v27, %v3037_v62  ;;  %v971_v23 = vsub.f32 %v810_v24, %v4127_v54 }
 0x180   :  { %vm1779_vm11 = vmpackc.low %vm1677_vm7, %vm1674_vm13  ;;  %v1841_v37 = vsel %vm1777_vm10, 16843009, %v4154_v61  ;;  %v1566_v30 = vadd.f32 %v1446_v16, %v3040_v7  ;;  %v1444_v53 = vmul.f32 %v964_v55, %v964_v55  ;;  %v1562_v58 = vadd.f32 %v1442_v39, %v3034_v46  ;;  %v822_v55 = vpop.permute.xlu1 %821 }
 0x181   :  { %vm1780_vm4 = vmpackc.even %vm1779_vm11, %vm3526_vm12  ;;  %1871 = vst [vmem:[#allocation2 + $0x60] sm:$0xff] %v1841_v37  ;;  %v1563_v63 = vadd.f32 %v1443_v48, %v3044_v33  ;;  %v972_v34 = vsub.f32 %v810_v24, %v4128_v47  ;;  %v973_v26 = vsub.f32 %v810_v24, %v4131_v22  ;;  %v1451_v36 = vmul.f32 %v971_v23, %v971_v23  ;;  %v818_v33 = vpop.permute.xlu0 %817  ;;  %v4223_v23 = vld [vmem:[#allocation54_spill] sm:$0xff] }
 0x182   :  { %vm1782_vm9 = vmpackc.low %vm1678_vm3, %vm1675_vm15  ;;  %v1842_v62 = vsel %vm1780_vm4, 16843009, %v4154_v61  ;;  %v1564_v7 = vadd.f32 %v1444_v53, %v3052_v42  ;;  %vm1682_vm8 = vcmp.lt.f32.partialorder %v1562_v58, 0.561001  ;;  %v968_v46 = vsub.f32 %v806_v40, %v4127_v54 }
 0x183   :  { %vm1783_vm12 = vmpackc.even %vm1782_vm9, %vm3534_vm0  ;;  %1872 = vst [vmem:[#allocation2 + $0x68] sm:$0xff] %v1842_v62  ;;  %vm1683_vm13 = vcmp.lt.f32.partialorder %v1563_v63, 0.561001  ;;  %v1567_v52 = vadd.f32 %v1447_v51, %v4213_v31  ;;  %v1452_v29 = vmul.f32 %v972_v34, %v972_v34  ;;  %v1453_v20 = vmul.f32 %v973_v26, %v973_v26  ;;  %v4225_v63 = vld [vmem:[#allocation58_spill] sm:$0xff]  ;;  %v4226_v34 = vld [vmem:[#allocation59_spill] sm:$0xff] }
 0x184   :  { %v1843_v21 = vsel %vm1783_vm12, 16843009, %v4154_v61  ;;  %vm3582_vm15 = vmpackc.low %vm1682_vm8, %vm1679_vm2  ;;  %vm1684_vm0 = vcmp.lt.f32.partialorder %v1564_v7, 0.561001  ;;  %v969_v28 = vsub.f32 %v806_v40, %v4128_v47  ;;  %v970_v25 = vsub.f32 %v806_v40, %v4131_v22 }
 0x185   :  { %1873 = vst [vmem:[#allocation2 + $0x70] sm:$0xff] %v1843_v21  ;;  %vm3587_vm5 = vmpackc.low %vm1683_vm13, %vm1680_vm14  ;;  %v1448_v43 = vmul.f32 %v968_v46, %v968_v46  ;;  %v1330_v44 = vadd.f32 %v3294_v4, %v4218_v19  ;;  %vm1685_vm2 = vcmp.lt.f32.partialorder %v1565_v3, 0.561001  ;;  %v1571_v8 = vadd.f32 %v1451_v36, %v3067_v17  ;;  %v4222_v4 = vld [vmem:[#allocation51_spill] sm:$0xff] }
 0x186   :  { %vm3597_vm7 = vmpackc.low %vm1684_vm0, %vm1681_vm1  ;;  %v977_v6 = vsub.f32 %v818_v33, %v4127_v54  ;;  %v1572_v45 = vadd.f32 %v1452_v29, %v4221_v50  ;;  %v1449_v12 = vmul.f32 %v969_v28, %v969_v28  ;;  %v1450_v0 = vmul.f32 %v970_v25, %v970_v25 }
 0x187   :  { %v1568_v35 = vadd.f32 %v1448_v43, %v3298_v57  ;;  %vm1686_vm14 = vcmp.lt.f32.partialorder %v1566_v30, 0.561001  ;;  %vm1687_vm6 = vcmp.lt.f32.partialorder %v1567_v52, 0.561001  ;;  %v1573_v18 = vadd.f32 %v1453_v20, %v4222_v4  ;;  %v826_v57 = vpop.permute.xlu0 %825  ;;  %v4224_v30 = vld [vmem:[#allocation57_spill] sm:$0xff] }
 0x188   :  { %v978_v5 = vsub.f32 %v818_v33, %v4128_v47  ;;  %v1569_v49 = vadd.f32 %v1449_v12, %v1329_v32  ;;  %v1570_v14 = vadd.f32 %v1450_v0, %v1330_v44  ;;  %v979_v17 = vsub.f32 %v818_v33, %v4131_v22  ;;  %v4227_v33 = vld [vmem:[#allocation55_spill] sm:$0xff]  ;;  %v4234_v12 = vld [vmem:[#allocation60_spill] sm:$0xff] }
 0x189   :  { %vm1688_vm1 = vcmp.lt.f32.partialorder %v1568_v35, 0.561001  ;;  %vm1691_vm3 = vcmp.lt.f32.partialorder %v1571_v8, 0.561001  ;;  %v1457_v27 = vmul.f32 %v977_v6, %v977_v6  ;;  %v974_v16 = vsub.f32 %v814_v11, %v4127_v54 }
 0x18a   :  { %vm1785_vm10 = vmpackc.low %vm1688_vm1, %vm1685_vm2  ;;  %v975_v15 = vsub.f32 %v814_v11, %v4128_v47  ;;  %vm1692_vm11 = vcmp.lt.f32.partialorder %v1572_v45, 0.561001  ;;  %vm1689_vm4 = vcmp.lt.f32.partialorder %v1569_v49, 0.561001  ;;  %vm1690_vm9 = vcmp.lt.f32.partialorder %v1570_v14, 0.561001 }
 0x18b   :  { %vm1786_vm12 = vmpackc.even %vm1785_vm10, %vm3582_vm15  ;;  %v976_v59 = vsub.f32 %v814_v11, %v4131_v22  ;;  %vm1693_vm8 = vcmp.lt.f32.partialorder %v1573_v18, 0.561001  ;;  %v1458_v38 = vmul.f32 %v978_v5, %v978_v5  ;;  %v1454_v32 = vmul.f32 %v974_v16, %v974_v16  ;;  %v834_v52 = vpop.permute.xlu0 %833  ;;  %v4235_v18 = vld [vmem:[#allocation56_spill] sm:$0xff]  ;;  %v4236_v49 = vld [vmem:[#allocation63_spill] sm:$0xff] }
 0x18c   :  { %vm1788_vm13 = vmpackc.low %vm1689_vm4, %vm1686_vm14  ;;  %v1844_v24 = vsel %vm1786_vm12, 16843009, %v4154_v61  ;;  %v1459_v39 = vmul.f32 %v979_v17, %v979_v17  ;;  %v1455_v48 = vmul.f32 %v975_v15, %v975_v15  ;;  %v983_v51 = vsub.f32 %v826_v57, %v4127_v54 }
 0x18d   :  { %vm1789_vm0 = vmpackc.even %vm1788_vm13, %vm3587_vm5  ;;  %1874 = vst [vmem:[#allocation2 + $0x78] sm:$0xff] %v1844_v24  ;;  %v1456_v37 = vmul.f32 %v976_v59, %v976_v59  ;;  %v1577_v40 = vadd.f32 %v1457_v27, %v4223_v23  ;;  %v1574_v53 = vadd.f32 %v1454_v32, %v4224_v30  ;;  %v984_v58 = vsub.f32 %v826_v57, %v4128_v47  ;;  %v4239_v30 = vld [vmem:[#allocation62_spill] sm:$0xff] }
 0x18e   :  { %vm1791_vm15 = vmpackc.low %vm1690_vm9, %vm1687_vm6  ;;  %v1845_v3 = vsel %vm1789_vm0, 16843009, %v4154_v61  ;;  %v1575_v62 = vadd.f32 %v1455_v48, %v4225_v63  ;;  %v985_v36 = vsub.f32 %v826_v57, %v4131_v22  ;;  %v1463_v7 = vmul.f32 %v983_v51, %v983_v51 }
 0x18f   :  { %vm1792_vm5 = vmpackc.even %vm1791_vm15, %vm3597_vm7  ;;  %1875 = vst [vmem:[#allocation2 + $0x80] sm:$0xff] %v1845_v3  ;;  %v1576_v26 = vadd.f32 %v1456_v37, %v4226_v34  ;;  %v1578_v21 = vadd.f32 %v1458_v38, %v4227_v33  ;;  %vm1694_vm2 = vcmp.lt.f32.partialorder %v1574_v53, 0.561001  ;;  %v980_v31 = vsub.f32 %v822_v55, %v4127_v54  ;;  %v842_v16 = vpop.permute.xlu0 %841  ;;  %v4238_v3 = vld [vmem:[#allocation65_spill] sm:$0xff] }
 0x190   :  { %v1846_v46 = vsel %vm1792_vm5, 16843009, %v4154_v61  ;;  %v1579_v60 = vadd.f32 %v1459_v39, %v3099_v41  ;;  %vm1695_vm7 = vcmp.lt.f32.partialorder %v1575_v62, 0.561001  ;;  %vm3635_vm6 = vmpackc.low %vm1694_vm2, %vm1691_vm3  ;;  %v1464_v20 = vmul.f32 %v984_v58, %v984_v58  ;;  %v830_v41 = vpop.permute.xlu1 %829  ;;  %v4237_v39 = vld [vmem:[#allocation61_spill] sm:$0xff]  ;;  %v4240_v58 = vld [vmem:[#allocation64_spill] sm:$0xff] }
 0x191   :  { %1876 = vst [vmem:[#allocation2 + $0x88] sm:$0xff] %v1846_v46  ;;  %vm1696_vm14 = vcmp.lt.f32.partialorder %v1576_v26, 0.561001  ;;  %vm1697_vm1 = vcmp.lt.f32.partialorder %v1577_v40, 0.561001  ;;  %vm3640_vm10 = vmpackc.low %vm1695_vm7, %vm1692_vm11  ;;  %v981_v28 = vsub.f32 %v822_v55, %v4128_v47  ;;  %v982_v25 = vsub.f32 %v822_v55, %v4131_v22  ;;  %v4241_v26 = vld [vmem:[#allocation66_spill] sm:$0xff] }
 0x192   :  { %v1460_v43 = vmul.f32 %v980_v31, %v980_v31  ;;  %vm3647_vm4 = vmpackc.low %vm1696_vm14, %vm1693_vm8  ;;  %v1465_v44 = vmul.f32 %v985_v36, %v985_v36  ;;  %v1583_v56 = vadd.f32 %v1463_v7, %v3113_v9  ;;  %v989_v8 = vsub.f32 %v834_v52, %v4127_v54 }
 0x193   :  { %v990_v6 = vsub.f32 %v834_v52, %v4128_v47  ;;  %vm1698_vm3 = vcmp.lt.f32.partialorder %v1578_v21, 0.561001  ;;  %v1461_v11 = vmul.f32 %v981_v28, %v981_v28  ;;  %v1462_v50 = vmul.f32 %v982_v25, %v982_v25  ;;  %v850_v21 = vpop.permute.xlu0 %849 }
 0x194   :  { %v1580_v45 = vadd.f32 %v1460_v43, %v3102_v1  ;;  %vm1699_vm11 = vcmp.lt.f32.partialorder %v1579_v60, 0.561001  ;;  %v1584_v0 = vadd.f32 %v1464_v20, %v4234_v12  ;;  %v991_v35 = vsub.f32 %v834_v52, %v4131_v22  ;;  %v838_v59 = vpop.permute.xlu1 %837  ;;  %v4248_v43 = vld [vmem:[#allocation74_spill] sm:$0xff] }
 0x195   :  { %v1469_v4 = vmul.f32 %v989_v8, %v989_v8  ;;  %v1581_v5 = vadd.f32 %v1461_v11, %v4235_v18  ;;  %v1582_v14 = vadd.f32 %v1462_v50, %v4236_v49  ;;  %v986_v9 = vsub.f32 %v830_v41, %v4127_v54  ;;  %v4249_v8 = vld [vmem:[#allocation73_spill] sm:$0xff]  ;;  %v4250_v11 = vld [vmem:[#allocation75_spill] sm:$0xff] }
 0x196   :  { %vm1700_vm9 = vcmp.lt.f32.partialorder %v1580_v45, 0.561001  ;;  %v1585_v17 = vadd.f32 %v1465_v44, %v3123_v2  ;;  %vm1703_vm12 = vcmp.lt.f32.partialorder %v1583_v56, 0.561001  ;;  %v1470_v27 = vmul.f32 %v990_v6, %v990_v6  ;;  %v4251_v45 = vld [vmem:[#allocation77_spill] sm:$0xff] }
 0x197   :  { %vm1794_vm8 = vmpackc.low %vm1700_vm9, %vm1697_vm1  ;;  %v987_v1 = vsub.f32 %v830_v41, %v4128_v47  ;;  %vm1701_vm13 = vcmp.lt.f32.partialorder %v1581_v5, 0.561001  ;;  %vm1702_vm0 = vcmp.lt.f32.partialorder %v1582_v14, 0.561001  ;;  %v988_v15 = vsub.f32 %v830_v41, %v4131_v22  ;;  %v858_v49 = vpop.permute.xlu0 %857 }
 0x198   :  { %vm1795_vm15 = vmpackc.even %vm1794_vm8, %vm3635_vm6  ;;  %v1466_v57 = vmul.f32 %v986_v9, %v986_v9  ;;  %vm1704_vm5 = vcmp.lt.f32.partialorder %v1584_v0, 0.561001  ;;  %v1471_v24 = vmul.f32 %v991_v35, %v991_v35  ;;  %v1589_v38 = vadd.f32 %v1469_v4, %v3138_v10  ;;  %v846_v60 = vpop.permute.xlu1 %845  ;;  %v4252_v4 = vld [vmem:[#allocation78_spill] sm:$0xff] }
 0x199   :  { %vm1797_vm2 = vmpackc.low %vm1701_vm13, %vm1698_vm3  ;;  %v1847_v2 = vsel %vm1795_vm15, 16843009, %v4154_v61  ;;  %v1467_v32 = vmul.f32 %v987_v1, %v987_v1  ;;  %v1468_v55 = vmul.f32 %v988_v15, %v988_v15  ;;  %v995_v37 = vsub.f32 %v842_v16, %v4127_v54 }
 0x19a   :  { %vm1798_vm7 = vmpackc.even %vm1797_vm2, %vm3640_vm10  ;;  %1877 = vst [vmem:[#allocation2 + $0x90] sm:$0xff] %v1847_v2  ;;  %v1586_v48 = vadd.f32 %v1466_v57, %v4237_v39  ;;  %v1590_v23 = vadd.f32 %v1470_v27, %v4238_v3  ;;  %v996_v40 = vsub.f32 %v842_v16, %v4128_v47  ;;  %v997_v10 = vsub.f32 %v842_v16, %v4131_v22  ;;  %v4253_v2 = vld [vmem:[#allocation76_spill] sm:$0xff] }
 0x19b   :  { %vm1800_vm14 = vmpackc.low %vm1702_vm0, %vm1699_vm11  ;;  %v1848_v51 = vsel %vm1798_vm7, 16843009, %v4154_v61  ;;  %v1587_v53 = vadd.f32 %v1467_v32, %v4239_v30  ;;  %v1588_v63 = vadd.f32 %v1468_v55, %v4240_v58  ;;  %v1475_v62 = vmul.f32 %v995_v37, %v995_v37  ;;  %v866_v30 = vpop.permute.xlu0 %865  ;;  %v4257_v58 = vld [vmem:[#allocation85_spill] sm:$0xff] }
 0x19c   :  { %vm1801_vm6 = vmpackc.even %vm1800_vm14, %vm3647_vm4  ;;  %1878 = vst [vmem:[#allocation2 + $0x98] sm:$0xff] %v1848_v51  ;;  %vm1706_vm1 = vcmp.lt.f32.partialorder %v1586_v48, 0.561001  ;;  %v1591_v36 = vadd.f32 %v1471_v24, %v4241_v26  ;;  %v1476_v46 = vmul.f32 %v996_v40, %v996_v40  ;;  %v992_v33 = vsub.f32 %v838_v59, %v4127_v54  ;;  %v854_v9 = vpop.permute.xlu1 %853  ;;  %v4255_v48 = vld [vmem:[#allocation84_spill] sm:$0xff]  ;;  %v4284_v26 = vld [vmem:[#allocation94_spill] sm:$0xff] }
 0x19d   :  { %v1849_v34 = vsel %vm1801_vm6, 16843009, %v4154_v61  ;;  %vm3686_vm10 = vmpackc.low %vm1706_vm1, %vm1703_vm12  ;;  %vm1707_vm4 = vcmp.lt.f32.partialorder %v1587_v53, 0.561001  ;;  %vm1708_vm3 = vcmp.lt.f32.partialorder %v1588_v63, 0.561001  ;;  %v1477_v31 = vmul.f32 %v997_v10, %v997_v10 }
 0x19e   :  { %1879 = vst [vmem:[#allocation2 + $0xa0] sm:$0xff] %v1849_v34  ;;  %v993_v52 = vsub.f32 %v838_v59, %v4128_v47  ;;  %vm1705_vm11 = vcmp.lt.f32.partialorder %v1585_v17, 0.561001  ;;  %vm1709_vm9 = vcmp.lt.f32.partialorder %v1589_v38, 0.561001  ;;  %vm3693_vm8 = vmpackc.low %vm1707_vm4, %vm1704_vm5  ;;  %v994_v20 = vsub.f32 %v838_v59, %v4131_v22  ;;  %v4254_v38 = vld [vmem:[#allocation79_spill] sm:$0xff] }
 0x19f   :  { %v1472_v42 = vmul.f32 %v992_v33, %v992_v33  ;;  %vm3698_vm12 = vmpackc.low %vm1708_vm3, %vm1705_vm11  ;;  %v1595_v25 = vadd.f32 %v1475_v62, %v3163_v13  ;;  %v1596_v41 = vadd.f32 %v1476_v46, %v4248_v43  ;;  %v1001_v44 = vsub.f32 %v850_v21, %v4127_v54  ;;  %v4258_v62 = vld [vmem:[#allocation86_spill] sm:$0xff] }
 0x1a0   :  { %v1473_v19 = vmul.f32 %v993_v52, %v993_v52  ;;  %vm1710_vm13 = vcmp.lt.f32.partialorder %v1590_v23, 0.561001  ;;  %vm1711_vm0 = vcmp.lt.f32.partialorder %v1591_v36, 0.561001  ;;  %v1474_v56 = vmul.f32 %v994_v20, %v994_v20  ;;  %v4256_v23 = vld [vmem:[#allocation80_spill] sm:$0xff]  ;;  %v862_v7 = vpop.permute.xlu1 %861 }
 0x1a1   :  { %v1592_v6 = vadd.f32 %v1472_v42, %v4249_v8  ;;  %v1597_v50 = vadd.f32 %v1477_v31, %v4250_v11  ;;  %v1002_v0 = vsub.f32 %v850_v21, %v4128_v47  ;;  %v1003_v35 = vsub.f32 %v850_v21, %v4131_v22  ;;  %v4265_v42 = vld [vmem:[#allocation90_spill] sm:$0xff] }
 0x1a2   :  { %v1593_v12 = vadd.f32 %v1473_v19, %v4251_v45  ;;  %v1594_v13 = vadd.f32 %v1474_v56, %v4252_v4  ;;  %v998_v18 = vsub.f32 %v846_v60, %v4127_v54  ;;  %v999_v5 = vsub.f32 %v846_v60, %v4128_v47  ;;  %v4266_v19 = vld [vmem:[#allocation81_spill] sm:$0xff]  ;;  %v4267_v56 = vld [vmem:[#allocation91_spill] sm:$0xff] }
 0x1a3   :  { %vm1712_vm15 = vcmp.lt.f32.partialorder %v1592_v6, 0.561001  ;;  %vm1715_vm5 = vcmp.lt.f32.partialorder %v1595_v25, 0.561001  ;;  %vm1716_vm2 = vcmp.lt.f32.partialorder %v1596_v41, 0.561001  ;;  %v1481_v14 = vmul.f32 %v1001_v44, %v1001_v44 }
 0x1a4   :  { %vm1713_vm7 = vcmp.lt.f32.partialorder %v1593_v12, 0.561001  ;;  %vm1803_vm14 = vmpackc.low %vm1712_vm15, %vm1709_vm9  ;;  %vm1714_vm6 = vcmp.lt.f32.partialorder %v1594_v13, 0.561001  ;;  %v1000_v17 = vsub.f32 %v846_v60, %v4131_v22  ;;  %v1478_v27 = vmul.f32 %v998_v18, %v998_v18  ;;  %v4268_v6 = vld [vmem:[#allocation82_spill] sm:$0xff]  ;;  %v870_v13 = vpop.permute.xlu1 %869  ;;  %v4270_v18 = vld [vmem:[#allocation87_spill] sm:$0xff] }
 0x1a5   :  { %vm1804_vm1 = vmpackc.even %vm1803_vm14, %vm3686_vm10  ;;  %v1479_v1 = vmul.f32 %v999_v5, %v999_v5  ;;  %vm1717_vm4 = vcmp.lt.f32.partialorder %v1597_v50, 0.561001  ;;  %v1482_v15 = vmul.f32 %v1002_v0, %v1002_v0  ;;  %v1483_v57 = vmul.f32 %v1003_v35, %v1003_v35  ;;  %v4269_v50 = vld [vmem:[#allocation83_spill] sm:$0xff] }
 0x1a6   :  { %vm1806_vm3 = vmpackc.low %vm1713_vm7, %vm1710_vm13  ;;  %v1850_v16 = vsel %vm1804_vm1, 16843009, %v4154_v61  ;;  %v1480_v59 = vmul.f32 %v1000_v17, %v1000_v17  ;;  %v1598_v24 = vadd.f32 %v1478_v27, %v4253_v2  ;;  %v1007_v55 = vsub.f32 %v858_v49, %v4127_v54  ;;  %v4272_v2 = vld [vmem:[#allocation88_spill] sm:$0xff] }
 0x1a7   :  { %vm1807_vm11 = vmpackc.even %vm1806_vm3, %vm3693_vm8  ;;  %1880 = vst [vmem:[#allocation2 + $0xa8] sm:$0xff] %v1850_v16  ;;  %v1599_v32 = vadd.f32 %v1479_v1, %v4254_v38  ;;  %v1601_v37 = vadd.f32 %v1481_v14, %v4255_v48  ;;  %v1008_v51 = vsub.f32 %v858_v49, %v4128_v47  ;;  %v1009_v3 = vsub.f32 %v858_v49, %v4131_v22  ;;  %v4273_v38 = vld [vmem:[#allocation89_spill] sm:$0xff] }
 0x1a8   :  { %vm1809_vm10 = vmpackc.low %vm1714_vm6, %vm1711_vm0  ;;  %v1851_v39 = vsel %vm1807_vm11, 16843009, %v4154_v61  ;;  %v1600_v40 = vadd.f32 %v1480_v59, %v4256_v23  ;;  %vm1718_vm8 = vcmp.lt.f32.partialorder %v1598_v24, 0.561001  ;;  %v1487_v10 = vmul.f32 %v1007_v55, %v1007_v55 }
 0x1a9   :  { %vm1810_vm9 = vmpackc.even %vm1809_vm10, %vm3698_vm12  ;;  %1881 = vst [vmem:[#allocation2 + $0xb0] sm:$0xff] %v1851_v39  ;;  %vm1719_vm13 = vcmp.lt.f32.partialorder %v1599_v32, 0.561001  ;;  %v1602_v63 = vadd.f32 %v1482_v15, %v4257_v58  ;;  %v1603_v34 = vadd.f32 %v1483_v57, %v4258_v62  ;;  %v1004_v36 = vsub.f32 %v854_v9, %v4127_v54  ;;  %v4271_v15 = vld [vmem:[#allocation96_spill] sm:$0xff] }
 0x1aa   :  { %v1852_v53 = vsel %vm1810_vm9, 16843009, %v4154_v61  ;;  %vm3737_vm0 = vmpackc.low %vm1718_vm8, %vm1715_vm5  ;;  %vm1720_vm12 = vcmp.lt.f32.partialorder %v1600_v40, 0.561001  ;;  %v1488_v33 = vmul.f32 %v1008_v51, %v1008_v51  ;;  %v1005_v21 = vsub.f32 %v854_v9, %v4128_v47  ;;  %v4279_v58 = vld [vmem:[#allocation92_spill] sm:$0xff] }
 0x1ab   :  { %1882 = vst [vmem:[#allocation2 + $0xb8] sm:$0xff] %v1852_v53  ;;  %vm3743_vm15 = vmpackc.low %vm1719_vm13, %vm1716_vm2  ;;  %v1006_v31 = vsub.f32 %v854_v9, %v4131_v22  ;;  %v1489_v60 = vmul.f32 %v1009_v3, %v1009_v3  ;;  %v1484_v29 = vmul.f32 %v1004_v36, %v1004_v36  ;;  %v1013_v20 = vsub.f32 %v866_v30, %v4127_v54  ;;  %v4275_v3 = vld [vmem:[#allocation95_spill] sm:$0xff] }
 0x1ac   :  { %vm3750_vm5 = vmpackc.low %vm1720_vm12, %vm1717_vm4  ;;  %v1607_v28 = vadd.f32 %v1487_v10, %v4265_v42  ;;  %v1485_v25 = vmul.f32 %v1005_v21, %v1005_v21  ;;  %v1014_v41 = vsub.f32 %v866_v30, %v4128_v47  ;;  %vm1721_vm2 = vcmp.lt.f32.partialorder %v1601_v37, 0.561001  ;;  %v4274_v37 = vld [vmem:[#allocation97_spill] sm:$0xff] }
 0x1ad   :  { %v1486_v43 = vmul.f32 %v1006_v31, %v1006_v31  ;;  %vm1722_vm7 = vcmp.lt.f32.partialorder %v1602_v63, 0.561001  ;;  %vm1723_vm14 = vcmp.lt.f32.partialorder %v1603_v34, 0.561001  ;;  %v1604_v44 = vadd.f32 %v1484_v29, %v4266_v19 }
 0x1ae   :  { %v1608_v8 = vadd.f32 %v1488_v33, %v4267_v56  ;;  %v1605_v11 = vadd.f32 %v1485_v25, %v4268_v6  ;;  %v1015_v12 = vsub.f32 %v866_v30, %v4131_v22  ;;  %v1493_v0 = vmul.f32 %v1013_v20, %v1013_v20  ;;  %v4278_v30 = vld [vmem:[#allocation93_spill] sm:$0xff] }
 0x1af   :  { %v1606_v45 = vadd.f32 %v1486_v43, %v4269_v50  ;;  %vm1724_vm6 = vcmp.lt.f32.partialorder %v1604_v44, 0.561001  ;;  %v1010_v35 = vsub.f32 %v862_v7, %v4127_v54  ;;  %v1011_v4 = vsub.f32 %v862_v7, %v4128_v47 }
 0x1b0   :  { %v1609_v5 = vadd.f32 %v1489_v60, %v4270_v18  ;;  %vm1727_vm1 = vcmp.lt.f32.partialorder %v1607_v28, 0.561001  ;;  %vm1725_vm4 = vcmp.lt.f32.partialorder %v1605_v11, 0.561001  ;;  %vm1812_vm3 = vmpackc.low %vm1724_vm6, %vm1721_vm2  ;;  %v1494_v49 = vmul.f32 %v1014_v41, %v1014_v41 }
 0x1b1   :  { %vm1726_vm11 = vcmp.lt.f32.partialorder %v1606_v45, 0.561001  ;;  %vm1813_vm10 = vmpackc.even %vm1812_vm3, %vm3737_vm0  ;;  %v1012_v14 = vsub.f32 %v862_v7, %v4131_v22  ;;  %v1490_v9 = vmul.f32 %v1010_v35, %v1010_v35  ;;  %v1491_v17 = vmul.f32 %v1011_v4, %v1011_v4  ;;  %v4285_v7 = vld [vmem:[#allocation21_spill] sm:$0xff] }
 0x1b2   :  { %vm1728_vm9 = vcmp.lt.f32.partialorder %v1608_v8, 0.561001  ;;  %vm1815_vm8 = vmpackc.low %vm1725_vm4, %vm1722_vm7  ;;  %v1853_v27 = vsel %vm1813_vm10, 16843009, %v4154_v61  ;;  %v1495_v1 = vmul.f32 %v1015_v12, %v1015_v12  ;;  %v1016_v16 = vsub.f32 %v870_v13, %v4127_v54 }
 0x1b3   :  { %vm1816_vm13 = vmpackc.even %vm1815_vm8, %vm3743_vm15  ;;  %1883 = vst [vmem:[#allocation2 + $0xc0] sm:$0xff] %v1853_v27  ;;  %v1613_v57 = vadd.f32 %v1493_v0, %v4271_v15  ;;  %v1492_v59 = vmul.f32 %v1012_v14, %v1012_v14  ;;  %v1610_v24 = vadd.f32 %v1490_v9, %v4272_v2  ;;  %v1611_v32 = vadd.f32 %v1491_v17, %v4273_v38 }
 0x1b4   :  { %vm1818_vm0 = vmpackc.low %vm1726_vm11, %vm1723_vm14  ;;  %v1854_v55 = vsel %vm1816_vm13, 16843009, %v4154_v61  ;;  %v1017_v39 = vsub.f32 %v870_v13, %v4128_v47  ;;  %v1018_v54 = vsub.f32 %v870_v13, %v4131_v22  ;;  %v1496_v48 = vmul.f32 %v1016_v16, %v1016_v16 }
 0x1b5   :  { %vm1819_vm12 = vmpackc.even %vm1818_vm0, %vm3750_vm5  ;;  %1884 = vst [vmem:[#allocation2 + $0xc8] sm:$0xff] %v1854_v55  ;;  %v1614_v51 = vadd.f32 %v1494_v49, %v4274_v37  ;;  %v1612_v23 = vadd.f32 %v1492_v59, %v4275_v3  ;;  %vm1730_vm15 = vcmp.lt.f32.partialorder %v1610_v24, 0.561001  ;;  %vm1731_vm2 = vcmp.lt.f32.partialorder %v1611_v32, 0.561001 }
 0x1b6   :  { %v1855_v40 = vsel %vm1819_vm12, 16843009, %v4154_v61  ;;  %vm3788_vm7 = vmpackc.low %vm1730_vm15, %vm1727_vm1  ;;  %v1497_v47 = vmul.f32 %v1017_v39, %v1017_v39  ;;  %v1498_v22 = vmul.f32 %v1018_v54, %v1018_v54  ;;  %v1616_v53 = vadd.f32 %v1496_v48, %v4278_v30 }
 0x1b7   :  { %vm1729_vm14 = vcmp.lt.f32.partialorder %v1609_v5, 0.561001  ;;  %1885 = vst [vmem:[#allocation2 + $0xd0] sm:$0xff] %v1855_v40  ;;  %v1615_v63 = vadd.f32 %v1495_v1, %v4279_v58  ;;  %vm1732_vm5 = vcmp.lt.f32.partialorder %v1612_v23, 0.561001  ;;  %vm3795_vm6 = vmpackc.low %vm1731_vm2, %vm1728_vm9 }
 0x1b8   :  { %vm1733_vm4 = vcmp.lt.f32.partialorder %v1613_v57, 0.561001  ;;  %vm3799_vm3 = vmpackc.low %vm1732_vm5, %vm1729_vm14  ;;  %v1617_v36 = vadd.f32 %v1497_v47, %v4284_v26  ;;  %v1618_v46 = vadd.f32 %v1498_v22, %v4285_v7  ;;  %vm1736_vm1 = vcmp.lt.f32.partialorder %v1616_v53, 0.561001 }
 0x1b9   :  { %vm1821_vm11 = vmpackc.low %vm1736_vm1, %vm1733_vm4  ;;  %vm1734_vm10 = vcmp.lt.f32.partialorder %v1614_v51, 0.561001  ;;  %vm1735_vm12 = vcmp.lt.f32.partialorder %v1615_v63, 0.561001 }
 0x1ba   :  { %vm1737_vm8 = vcmp.lt.f32.partialorder %v1617_v36, 0.561001  ;;  %vm1738_vm13 = vcmp.lt.f32.partialorder %v1618_v46, 0.561001  ;;  %vm1822_vm9 = vmpackc.even %vm1821_vm11, %vm3788_vm7 }
 0x1bb   :  { %vm1824_vm0 = vmpackc.low %vm1737_vm8, %vm1734_vm10  ;;  %v1856_v33 = vsel %vm1822_vm9, 16843009, %v4154_v61 }
 0x1bc   :  { %vm1825_vm15 = vmpackc.even %vm1824_vm0, %vm3795_vm6  ;;  %1886 = vst [vmem:[#allocation2 + $0xd8] sm:$0xff] %v1856_v33 }
 0x1bd   :  { %vm1827_vm2 = vmpackc.low %vm1738_vm13, %vm1735_vm12  ;;  %v1857_v21 = vsel %vm1825_vm15, 16843009, %v4154_v61 }
 0x1be   :  { %vm1828_vm14 = vmpackc.even %vm1827_vm2, %vm3799_vm3  ;;  %1887 = vst [vmem:[#allocation2 + $0xe0] sm:$0xff] %v1857_v21 }
 0x1bf   :  { %v1858_v31 = vsel %vm1828_vm14, 16843009, %v4154_v61 }
 0x1c0   :  { %1888 = vst [vmem:[#allocation2 + $0xe8] sm:$0xff] %v1858_v31 }
 0x1c1   :  { %1930 = shalt.err (!%p1927_p4)
}
 0x1c2   :  { %s1931_s16 = scalar_lea.hbm %s3828_s2, 3840 }
 0x1c3   :  { %p1932_p5 = scmp.ne.s32.totalorder %s3828_s2, %s1931_s16  ;;  %p1935_p6 = scmp.lt.u32.totalorder %s1931_s16, %s3828_s2 }
 0x1c5   :  { %p1937_p7 = pnand %p1935_p6, %p1932_p5 }
 0x1c7   :  { %1940 = shalt.err (!%p1937_p7)
}
 0x1c8   :  { %s1947_s21 = smov 384   ;;  %s1948_s22 = smov 24  }
 0x1c9   :  { %1900 = dma.vmem_to_hbm [thread:$0]  %s1895_s12, 3840, %s3828_s2, [#allocation3], %s1947_s21, %s1947_s21, %s1948_s22  }
 0x1ca   :  { %1941 = dma.done.wait [#allocation3], 3840  }
 0x1cb   :  { %1942 = vsyncadd [#allocation3], 4294963456 }
 0x1cc   :  { %1904 = vsyncpa [#allocation3], 1 }

</bundles_post_ra>
